<compile_context>
chip_gen: v5e
topology: v5e:2x2
jax: 0.10.0
libtpu: 0.0.40
codegen_flags: <defaults>
</compile_context>

<pallas_src>
import jax
import jax.numpy as jnp
from jax.experimental import pallas as pl
from jax.experimental.pallas import tpu as pltpu

# ----- small shapes consistent with the module's __init__ ------------------
INPUT_SIZE = 16        # module input_size (224 in the original)
PATCH_H = 12           # patch_H_size
PATCH_W = 12           # patch_W_size
C_OUT = 3              # channel_out
BATCH = 2              # real batch
B_PAD = 8              # sublane-aligned LHS rows (zero-padded; amortizes w1/w2)
PRE_MODEL_DIM = 1000   # pre_model logit dimension
NUM_CLASSES = 10       # new_layers = nn.Linear(1000, 10)

# lane-aligned (padded) head dims: 1000 -> 1024 (8*128), 10 -> 128
PRE_PAD = 1024
OUT_PAD = 128
HID_TILE = 512                    # streamed hidden-dim chunk
N_HID = PRE_PAD // HID_TILE       # grid extent (= 2)

H_START = INPUT_SIZE // 2 - PATCH_H // 2
H_END = H_START + PATCH_H
W_START = INPUT_SIZE // 2 - PATCH_W // 2
W_END = W_START + PATCH_W

FEAT_DIM = C_OUT * INPUT_SIZE * INPUT_SIZE   # 768 = 6 * 128 (lane-dense)


# ---------------------------------------------------------------------------
# Fused streamed kernel.  For each hidden-dim chunk h:
#   x_adv      = tanh(W*M) + x_pad                       (lane-dense (B,768))
#   feats_h    = x_adv @ w1[:, h*512:(h+1)*512] + b1_h   # TODO(synk): stand-in
#                                                        # for the frozen
#                                                        # pretrained backbone
#                                                        # (no checkpoint here)
#   acc       += feats_h @ w2[h*512:(h+1)*512, :]        # exact Linear(1000,10)
# last step:  out = acc + b2
# Weights are bf16 (HBM-bandwidth bound path); MXU accumulates in f32.
# ---------------------------------------------------------------------------
def fused_kernel(xpad_ref, w_ref, m_ref, w1_ref, b1_ref, w2_ref, b2_ref,
                 o_ref, acc_ref):
    # xpad_ref: (B_PAD, F) f32      w_ref/m_ref: (1, F) f32
    # w1_ref: (F, HID_TILE) bf16    b1_ref: (1, HID_TILE) f32
    # w2_ref: (HID_TILE, OUT_PAD) bf16   b2_ref: (1, OUT_PAD) f32
    # o_ref:  (B_PAD, OUT_PAD) f32  acc_ref: (B_PAD, OUT_PAD) f32 scratch
    h = pl.program_id(0)

    @pl.when(h == 0)
    def _():
        acc_ref[...] = jnp.zeros_like(acc_ref)

    # cheap (8x768) elementwise work; recomputing per chunk costs nothing
    # relative to the weight DMA / MXU push that dominates this kernel.
    p = jnp.tanh(w_ref[...] * m_ref[...])                     # (1, F)
    x_adv = p + xpad_ref[...]                                 # (B_PAD, F)

    feats = jnp.dot(x_adv.astype(jnp.bfloat16), w1_ref[...],
                    preferred_element_type=jnp.float32) + b1_ref[...]
    acc_ref[...] += jnp.dot(feats.astype(jnp.bfloat16), w2_ref[...],
                            preferred_element_type=jnp.float32)

    @pl.when(h == pl.num_programs(0) - 1)
    def _():
        o_ref[...] = acc_ref[...] + b2_ref[...]


def reprogramming_forward(image, params):
    B = image.shape[0]
    # one-time XLA paste of the image into the zero canvas (outside the
    # kernel -> no masked sub-window stores), then flatten lane-dense and
    # zero-pad the batch rows to a sublane multiple.
    x_pad = jnp.zeros((B, C_OUT, INPUT_SIZE, INPUT_SIZE), jnp.float32)
    x_pad = x_pad.at[:, :, H_START:H_END, W_START:W_END].set(image)
    x_pad_flat = jnp.zeros((B_PAD, FEAT_DIM), jnp.float32)
    x_pad_flat = x_pad_flat.at[:B].set(x_pad.reshape(B, FEAT_DIM))
    w_flat = params["W"].reshape(1, FEAT_DIM)
    m_flat = params["M"].reshape(1, FEAT_DIM)

    out_pad = pl.pallas_call(
        fused_kernel,
        out_shape=jax.ShapeDtypeStruct((B_PAD, OUT_PAD), jnp.float32),
        grid=(N_HID,),
        in_specs=[
            pl.BlockSpec((B_PAD, FEAT_DIM), lambda h: (0, 0)),
            pl.BlockSpec((1, FEAT_DIM), lambda h: (0, 0)),
            pl.BlockSpec((1, FEAT_DIM), lambda h: (0, 0)),
            pl.BlockSpec((FEAT_DIM, HID_TILE), lambda h: (0, h)),   # streamed
            pl.BlockSpec((1, HID_TILE), lambda h: (0, h)),          # streamed
            pl.BlockSpec((HID_TILE, OUT_PAD), lambda h: (h, 0)),    # streamed
            pl.BlockSpec((1, OUT_PAD), lambda h: (0, 0)),
        ],
        out_specs=pl.BlockSpec((B_PAD, OUT_PAD), lambda h: (0, 0)),
        scratch_shapes=[pltpu.VMEM((B_PAD, OUT_PAD), jnp.float32)],
        compiler_params=pltpu.CompilerParams(
            dimension_semantics=("arbitrary",)),
    )(x_pad_flat, w_flat, m_flat,
      params["w1"], params["b1"], params["w2"], params["b2"])

    # padded rows/columns are exact zeros, so [:B, :10] is the exact result
    return out_pad[:B, :NUM_CLASSES]


# ---------------------------------------------------------------------------
# Pure-JAX reference (mirrors the bf16 weight / activation rounding so the
# check against the MXU path stays tight).
# ---------------------------------------------------------------------------
def reference(image, params):
    B = image.shape[0]
    X = jnp.zeros((B, C_OUT, INPUT_SIZE, INPUT_SIZE), jnp.float32)
    X = X.at[:, :, H_START:H_END, W_START:W_END].set(image)
    P = jnp.tanh(params["W"] * params["M"])
    x_adv = (P[None] + X).reshape(B, FEAT_DIM)

    x_bf = x_adv.astype(jnp.bfloat16).astype(jnp.float32)
    w1 = params["w1"].astype(jnp.float32)
    feats = jnp.dot(x_bf, w1, precision=jax.lax.Precision.HIGHEST) \
        + params["b1"]
    f_bf = feats.astype(jnp.bfloat16).astype(jnp.float32)
    w2 = params["w2"].astype(jnp.float32)
    out = jnp.dot(f_bf, w2, precision=jax.lax.Precision.HIGHEST) \
        + params["b2"]
    return out[:, :NUM_CLASSES]


if __name__ == "__main__":
    key = jax.random.PRNGKey(0)
    k_img, k_w, k_w1, k_b1, k_w2, k_b2 = jax.random.split(key, 6)

    image = jax.random.normal(k_img, (BATCH, C_OUT, PATCH_H, PATCH_W),
                              dtype=jnp.float32)

    # mask M: ones everywhere, zeros in the centered patch window
    mask = jnp.ones((C_OUT, INPUT_SIZE, INPUT_SIZE), jnp.float32)
    mask = mask.at[:, H_START:H_END, W_START:W_END].set(0.0)

    # unpadded head params (synthetic pre_model head + real Linear(1000, 10))
    w1_full = jax.random.normal(k_w1, (FEAT_DIM, PRE_MODEL_DIM),
                                dtype=jnp.float32) * 0.02
    b1_full = jax.random.normal(k_b1, (PRE_MODEL_DIM,),
                                dtype=jnp.float32) * 0.02
    w2_full = jax.random.normal(k_w2, (PRE_MODEL_DIM, NUM_CLASSES),
                                dtype=jnp.float32) * 0.02
    b2_full = jax.random.normal(k_b2, (NUM_CLASSES,),
                                dtype=jnp.float32) * 0.02

    # zero-pad the lane-misaligned dims (1000 -> 1024, 10 -> 128); zeros in
    # the padded w2 rows / columns keep the real 10 outputs bit-identical.
    w1 = jnp.zeros((FEAT_DIM, PRE_PAD), jnp.float32)
    w1 = w1.at[:, :PRE_MODEL_DIM].set(w1_full)
    b1 = jnp.zeros((1, PRE_PAD), jnp.float32)
    b1 = b1.at[0, :PRE_MODEL_DIM].set(b1_full)
    w2 = jnp.zeros((PRE_PAD, OUT_PAD), jnp.float32)
    w2 = w2.at[:PRE_MODEL_DIM, :NUM_CLASSES].set(w2_full)
    b2 = jnp.zeros((1, OUT_PAD), jnp.float32)
    b2 = b2.at[0, :NUM_CLASSES].set(b2_full)

    params = {
        "W": jax.random.normal(k_w, (C_OUT, INPUT_SIZE, INPUT_SIZE),
                               dtype=jnp.float32),          # torch.randn init
        "M": mask,
        "w1": w1.astype(jnp.bfloat16),   # bf16 weights, f32 accumulation
        "b1": b1,
        "w2": w2.astype(jnp.bfloat16),
        "b2": b2,
    }

    out = jax.jit(reprogramming_forward)(image, params)
    out = jax.block_until_ready(out)

    ref = reference(image, params)
    assert out.shape == (BATCH, NUM_CLASSES)
    assert jnp.allclose(out, ref, rtol=1e-2, atol=1e-2), "mismatch vs reference"

    print("KERNEL_OK")
</pallas_src>

<mosaic_0001>
module attributes {stable_mosaic.version = 11 : i64} {
  func.func @fused_kernel(%arg0: i32, %arg1: memref<8x768xf32, #tpu.memory_space<vmem>>, %arg2: memref<1x768xf32, #tpu.memory_space<vmem>>, %arg3: memref<1x768xf32, #tpu.memory_space<vmem>>, %arg4: memref<768x512xbf16, #tpu.memory_space<vmem>>, %arg5: memref<1x512xf32, #tpu.memory_space<vmem>>, %arg6: memref<512x128xbf16, #tpu.memory_space<vmem>>, %arg7: memref<1x128xf32, #tpu.memory_space<vmem>>, %arg8: memref<8x128xf32, #tpu.memory_space<vmem>>, %arg9: memref<8x128xf32, #tpu.memory_space<vmem>>) attributes {dimension_semantics = [#tpu.dimension_semantics<arbitrary>], iteration_bounds = array<i64: 2>, scalar_prefetch = 0 : i64, scratch_operands = 1 : i64, tpu.core_type = #tpu.core_type<tc>, window_params = [{pipeline_mode = #tpu.pipeline_mode<synchronous>, transform_indices = @transform_0, window_bounds = array<i64: 8, 768>}, {pipeline_mode = #tpu.pipeline_mode<synchronous>, transform_indices = @transform_1, window_bounds = array<i64: 1, 768>}, {pipeline_mode = #tpu.pipeline_mode<synchronous>, transform_indices = @transform_2, window_bounds = array<i64: 1, 768>}, {transform_indices = @transform_3, window_bounds = array<i64: 768, 512>}, {transform_indices = @transform_4, window_bounds = array<i64: 1, 512>}, {transform_indices = @transform_5, window_bounds = array<i64: 512, 128>}, {pipeline_mode = #tpu.pipeline_mode<synchronous>, transform_indices = @transform_6, window_bounds = array<i64: 1, 128>}, {pipeline_mode = #tpu.pipeline_mode<synchronous>, transform_indices = @transform_7, window_bounds = array<i64: 8, 128>}]} {
    %c0_i32 = arith.constant 0 : i32
    %0 = arith.cmpi eq, %arg0, %c0_i32 : i32
    %1 = arith.extui %0 : i1 to i32
    %c0_i32_0 = arith.constant 0 : i32
    %2 = arith.cmpi ne, %1, %c0_i32_0 : i32
    scf.if %2 {
      %cst_18 = arith.constant 0.000000e+00 : f32
      %25 = vector.broadcast %cst_18 : f32 to vector<8x128xf32>
      %c0_19 = arith.constant 0 : index
      %c0_20 = arith.constant 0 : index
      %26 = vector.load %arg9[%c0_19, %c0_20] : memref<8x128xf32, #tpu.memory_space<vmem>>, vector<8x128xf32>
      tpu.vector_store %arg9[%c0_19, %c0_20], %25 {strides = array<i32>} : memref<8x128xf32, #tpu.memory_space<vmem>>, vector<8x128xf32>,
    } else {
    }
    %c0 = arith.constant 0 : index
    %c0_1 = arith.constant 0 : index
    %3 = vector.load %arg2[%c0, %c0_1] : memref<1x768xf32, #tpu.memory_space<vmem>>, vector<1x768xf32>
    %c0_2 = arith.constant 0 : index
    %c0_3 = arith.constant 0 : index
    %4 = vector.load %arg3[%c0_2, %c0_3] : memref<1x768xf32, #tpu.memory_space<vmem>>, vector<1x768xf32>
    %5 = arith.mulf %3, %4 : vector<1x768xf32>
    %6 = math.tanh %5 : vector<1x768xf32>
    %c0_4 = arith.constant 0 : index
    %c0_5 = arith.constant 0 : index
    %7 = vector.load %arg1[%c0_4, %c0_5] : memref<8x768xf32, #tpu.memory_space<vmem>>, vector<8x768xf32>
    %8 = vector.broadcast %6 : vector<1x768xf32> to vector<8x768xf32>
    %9 = arith.addf %8, %7 : vector<8x768xf32>
    %10 = arith.truncf %9 : vector<8x768xf32> to vector<8x768xbf16>
    %c0_6 = arith.constant 0 : index
    %c0_7 = arith.constant 0 : index
    %11 = vector.load %arg4[%c0_6, %c0_7] : memref<768x512xbf16, #tpu.memory_space<vmem>>, vector<768x512xbf16>
    %cst = arith.constant dense<0.000000e+00> : vector<8x512xf32>
    %12 = tpu.matmul %10, %11, %cst {dimension_numbers = #tpu.dot_dimension_numbers<[1], [0], [0], [1], [0, 0, 1, 1], [], []>} : vector<8x768xbf16>, vector<768x512xbf16>, vector<8x512xf32> -> vector<8x512xf32>
    %c0_8 = arith.constant 0 : index
    %c0_9 = arith.constant 0 : index
    %13 = vector.load %arg5[%c0_8, %c0_9] : memref<1x512xf32, #tpu.memory_space<vmem>>, vector<1x512xf32>
    %14 = vector.broadcast %13 : vector<1x512xf32> to vector<8x512xf32>
    %15 = arith.addf %12, %14 : vector<8x512xf32>
    %c0_10 = arith.constant 0 : index
    %c0_11 = arith.constant 0 : index
    %16 = vector.load %arg9[%c0_10, %c0_11] : memref<8x128xf32, #tpu.memory_space<vmem>>, vector<8x128xf32>
    %17 = arith.truncf %15 : vector<8x512xf32> to vector<8x512xbf16>
    %c0_12 = arith.constant 0 : index
    %c0_13 = arith.constant 0 : index
    %18 = vector.load %arg6[%c0_12, %c0_13] : memref<512x128xbf16, #tpu.memory_space<vmem>>, vector<512x128xbf16>
    %cst_14 = arith.constant dense<0.000000e+00> : vector<8x128xf32>
    %19 = tpu.matmul %17, %18, %cst_14 {dimension_numbers = #tpu.dot_dimension_numbers<[1], [0], [0], [1], [0, 0, 1, 1], [], []>} : vector<8x512xbf16>, vector<512x128xbf16>, vector<8x128xf32> -> vector<8x128xf32>
    %20 = arith.addf %16, %19 : vector<8x128xf32>
    %c0_15 = arith.constant 0 : index
    %c0_16 = arith.constant 0 : index
    %21 = vector.load %arg9[%c0_15, %c0_16] : memref<8x128xf32, #tpu.memory_space<vmem>>, vector<8x128xf32>
    tpu.vector_store %arg9[%c0_15, %c0_16], %20 {strides = array<i32>} : memref<8x128xf32, #tpu.memory_space<vmem>>, vector<8x128xf32>,
    %c1_i32 = arith.constant 1 : i32
    %22 = arith.cmpi eq, %arg0, %c1_i32 : i32
    %23 = arith.extui %22 : i1 to i32
    %c0_i32_17 = arith.constant 0 : i32
    %24 = arith.cmpi ne, %23, %c0_i32_17 : i32
    scf.if %24 {
      %c0_18 = arith.constant 0 : index
      %c0_19 = arith.constant 0 : index
      %25 = vector.load %arg9[%c0_18, %c0_19] : memref<8x128xf32, #tpu.memory_space<vmem>>, vector<8x128xf32>
      %c0_20 = arith.constant 0 : index
      %c0_21 = arith.constant 0 : index
      %26 = vector.load %arg7[%c0_20, %c0_21] : memref<1x128xf32, #tpu.memory_space<vmem>>, vector<1x128xf32>
      %27 = vector.broadcast %26 : vector<1x128xf32> to vector<8x128xf32>
      %28 = arith.addf %25, %27 : vector<8x128xf32>
      %c0_22 = arith.constant 0 : index
      %c0_23 = arith.constant 0 : index
      %29 = vector.load %arg8[%c0_22, %c0_23] : memref<8x128xf32, #tpu.memory_space<vmem>>, vector<8x128xf32>
      tpu.vector_store %arg8[%c0_22, %c0_23], %28 {strides = array<i32>} : memref<8x128xf32, #tpu.memory_space<vmem>>, vector<8x128xf32>,
    } else {
    }
    return
  }
  func.func @transform_0(%arg0: i32) -> (i32, i32) {
    %c0_i32 = arith.constant 0 : i32
    %c0_i32_0 = arith.constant 0 : i32
    %c0_i32_1 = arith.constant 0 : i32
    return %c0_i32, %c0_i32_0 : i32, i32
  }
  func.func @transform_1(%arg0: i32) -> (i32, i32) {
    %c0_i32 = arith.constant 0 : i32
    %c0_i32_0 = arith.constant 0 : i32
    %c0_i32_1 = arith.constant 0 : i32
    return %c0_i32, %c0_i32_0 : i32, i32
  }
  func.func @transform_2(%arg0: i32) -> (i32, i32) {
    %c0_i32 = arith.constant 0 : i32
    %c0_i32_0 = arith.constant 0 : i32
    %c0_i32_1 = arith.constant 0 : i32
    return %c0_i32, %c0_i32_0 : i32, i32
  }
  func.func @transform_3(%arg0: i32) -> (i32, i32) {
    %c0_i32 = arith.constant 0 : i32
    %c0_i32_0 = arith.constant 0 : i32
    return %c0_i32, %arg0 : i32, i32
  }
  func.func @transform_4(%arg0: i32) -> (i32, i32) {
    %c0_i32 = arith.constant 0 : i32
    %c0_i32_0 = arith.constant 0 : i32
    return %c0_i32, %arg0 : i32, i32
  }
  func.func @transform_5(%arg0: i32) -> (i32, i32) {
    %c0_i32 = arith.constant 0 : i32
    %c0_i32_0 = arith.constant 0 : i32
    return %arg0, %c0_i32 : i32, i32
  }
  func.func @transform_6(%arg0: i32) -> (i32, i32) {
    %c0_i32 = arith.constant 0 : i32
    %c0_i32_0 = arith.constant 0 : i32
    %c0_i32_1 = arith.constant 0 : i32
    return %c0_i32, %c0_i32_0 : i32, i32
  }
  func.func @transform_7(%arg0: i32) -> (i32, i32) {
    %c0_i32 = arith.constant 0 : i32
    %c0_i32_0 = arith.constant 0 : i32
    %c0_i32_1 = arith.constant 0 : i32
    return %c0_i32, %c0_i32_0 : i32, i32
  }
}

</mosaic_0001>

<bundles_post_ra>
// kernel: reprogramming_forward.1
= control target key start
LH: loop header
LB: loop body
LE: loop exit
PB: predicated region body
PF: predicated region fallthrough
CT: control target
= control target key end

     0   :  { %s4395_s0 = inlined_call_operand.vmem [shape: f32[8,768], index: 0, kind: input, shape index: {}]   ;;  %s4396_s1 = inlined_call_operand.vmem [shape: f32[1,768], index: 1, kind: input, shape index: {}]   ;;  %s4397_s2 = inlined_call_operand.vmem [shape: f32[1,768], index: 2, kind: input, shape index: {}]   ;;  %s4398_s3 = inlined_call_operand.hbm [shape: bf16[768,1024], index: 3, kind: input, shape index: {}]   ;;  %s4399_s4 = inlined_call_operand.hbm [shape: f32[1,1024], index: 4, kind: input, shape index: {}]   ;;  %s4400_s5 = inlined_call_operand.hbm [shape: bf16[1024,128], index: 5, kind: input, shape index: {}]   ;;  %s4401_s6 = inlined_call_operand.hbm [shape: f32[1,128], index: 6, kind: input, shape index: {}]   ;;  %s4402_s7 = inlined_call_operand.vmem [shape: f32[8,128], index: 7, kind: output, shape index: {}]  }
   0x1   :  { %4404 = sst [smem:[#allocation15_spill]] %s4399_s4 }
   0x2   :  { %4405 = sst [smem:[#allocation16_spill]] %s4401_s6 }
   0x3   :  { %12 = vsyncpa [#allocation4], 0 }
   0x4   :  { %14 = vsyncpa [#allocation4 + $0x1], 0 }
   0x5   :  { %15 = vsyncpa [#allocation6], 0 }
   0x6   :  { %17 = vsyncpa [#allocation6 + $0x1], 0 }
   0x7   :  { %18 = vsyncpa [#allocation9], 0  ;;  %s3737_s24 = smov 0   ;;  %s3739_s25 = smov 0  }
   0x8   :  { %s3741_s26 = smov 0   ;;  %s3743_s27 = smov 0  }
   0x9 LB: > { %4406 = sst [smem:[#allocation13_spill]] %s3684_s26  ;;  %s3758_s28 = sadd.s32 1, %s3688_s27   ;;  %s3688_s27 = sphi %s3743_s27, %s4418_s27   ;;  %s3684_s26 = sphi %s3741_s26, %s4415_s26   ;;  %s3680_s25 = sphi %s3739_s25, %s4417_s25   ;;  %s3676_s24 = sphi %s3737_s24, %s4416_s24  }
   0xa   : > { %s94_s29 = sadd.s32 1, %s3684_s26  ;;  %s91_s30 = ssub.s32 %s3688_s27, %s3758_s28 }
   0xb   : > { %p101_p0 = scmp.ne.s32.totalorder %s3684_s26, %s3680_s25  ;;  %p92_p1 = scmp.eq.s32.totalorder %s91_s30, 0 }
   0xc   : > { %p102_p2 = scmp.eq.s32.totalorder %s3688_s27, 0  ;;  %p3482_p3 = scmp.lt.s32.totalorder %s3688_s27, 2 }
   0xd   : > { %s3768_s8 = scalar_select %p92_p1, %s3684_s26, %s94_s29  }
   0xe   : > { %p103_p4 = por %p102_p2, %p101_p0  ;;  %s3771_s9 = sand.u32 1, %s3684_s26  }
   0xf   : > { %4407 = sst [smem:[#allocation14_spill]] %s3768_s8  ;;  %s3455_s10 = smul.u32 1536, %s3771_s9 }
  0x10   : > { %s268_s11 = sand.u32 1, %s3688_s27   ;;  %p3775_p5 = pnand %p3482_p3, %p103_p4 }
  0x11   : > { %s2320_s13 = sshll.u32 %s3771_s9, 2  ;;  %s2321_s14 = sshll.u32 %s3688_s27, 2 }
  0x12   : > { %s4409_s4 = sld [smem:[#allocation15_spill]]  ;;  %s272_s18 = scalar_lea.vmem [#allocation5], %s2320_s13 }
  0x13   : > { %s280_s19 = sshll.u32 %s272_s18, 4  ;;  %s3785_s22 = scalar_lea.sflag [#allocation6], %s268_s11  ;;  %s281_s19 = int_to_ptr.vmem [resolvable:$true] %s280_s19 }
  0x14   : > { %p3530_p7 = pneg %p3775_p5 }
  0x18   : > { %s276_s17 = scalar_lea.hbm %s4409_s4, %s2321_s14  ;;  %s3533_s13 = scalar_lea.hbm %s4409_s4, 8 }
  0x19   : > { %s278_s20 = sshll.u32 %s276_s17, 4  ;;  %s279_s20 = int_to_ptr.hbm [resolvable:$true] %s278_s20 }
  0x1a   : > { %s3526_s23 = sshra.s32 %s279_s20, 4  ;;  %s3527_s23 = int_to_ptr.hbm [resolvable:$true] %s3526_s23 }
  0x1b   : > { %s3528_s29 = scalar_lea.hbm %s3527_s23, 4  ;;  %p3534_p10 = scmp.lt.s32.totalorder %s3527_s23, %s4409_s4 }
  0x1c   : > { %p3529_p6 = scmp.ne.s32.totalorder %s3527_s23, %s3528_s29  ;;  %p3535_p11 = scmp.lt.s32.totalorder %s3533_s13, %s3528_s29 }
  0x1e   : > { %p3531_p8 = pnand %p3530_p7, %p3529_p6  ;;  %p3536_p12 = por %p3535_p11, %p3534_p10 }
  0x20   : > { %p3532_p9 = pneg %p3531_p8 }
  0x22   : > { %p3537_p13 = pnand %p3536_p12, %p3532_p9 }
  0x24   : > { %3540 = shalt.err (!%p3537_p13)
}
  0x25   : > { %3477 = dma.hbm_to_vmem [thread:$0]  (!%p3775_p5), %s279_s20, 64, %s281_s19, %s3785_s22  }
  0x26   : > { %s3802_s11 = sadd.s32 4294967295, %s3688_s27   ;;  %p107_p1 = scmp.ne.s32.totalorder %s3680_s25, %s3676_s24 }
  0x27   : > { %p108_p0 = scmp.eq.s32.totalorder %s3802_s11, 0  ;;  %p2315_p2 = scmp.ge.s32.totalorder %s3688_s27, 1 }
  0x28   : > { %p212_p3 = scmp.lt.s32.totalorder %s3688_s27, 3  ;;  %p2316_p4 = scmp.ne.s32.totalorder %s3802_s11, 0 }
  0x29   : > { %p3812_p6 = por %p108_p0, %p107_p1  ;;  %s4411_s6 = sld [smem:[#allocation16_spill]] }
  0x2a   : > { %p3819_p8 = pnand %p2315_p2, %p212_p3  ;;  %s3690_s24 = smov [#allocation8]  }
  0x2b   : > { %s235_s29 = sshll.u32 %s3690_s24, 4  ;;  %s3229_s30 = sshll.u32 %s3688_s27, 4  ;;  %s236_s29 = int_to_ptr.vmem [resolvable:$true] %s235_s29 }
  0x2c   : > { %p3467_p9 = pneg %p3819_p8  ;;  %s255_s15 = scalar_lea.hbm %s4398_s3, %s3229_s30 }
  0x2d   : > { %s250_s16 = scalar_lea.vmem [#allocation3], %s3455_s10  ;;  %s256_s19 = sshll.u32 %s255_s15, 4  ;;  %s257_s19 = int_to_ptr.hbm [resolvable:$true] %s256_s19 }
  0x2e   : > { %p3468_p10 = pnand %p3467_p9, %p108_p0  ;;  %s258_s18 = sshll.u32 %s250_s16, 4  ;;  %s259_s18 = int_to_ptr.vmem [resolvable:$true] %s258_s18 }
  0x2f   : > { %s233_s20 = sshll.u32 %s4411_s6, 4  ;;  %s247_s21 = scalar_lea.sflag [#allocation4], %s3771_s9  ;;  %s234_s20 = int_to_ptr.hbm [resolvable:$true] %s233_s20 }
  0x30   : > { %3470 = dma.hbm_to_vmem [thread:$0]  (!%p3468_p10), %s234_s20, 16, %s236_s29, [#allocation9]  }
  0x31   : > { %s3586_s4 = sshra.s32 %s257_s19, 4  ;;  %s3593_s30 = scalar_lea.hbm %s4398_s3, 3072  ;;  %s3587_s4 = int_to_ptr.hbm [resolvable:$true] %s3586_s4 }
  0x32   : > { %s3588_s24 = scalar_lea.hbm %s3587_s4, 1536  ;;  %p3594_p1 = scmp.lt.s32.totalorder %s3587_s4, %s4398_s3 }
  0x33   : > { %p3589_p11 = scmp.ne.s32.totalorder %s3587_s4, %s3588_s24  ;;  %p3595_p2 = scmp.lt.s32.totalorder %s3593_s30, %s3588_s24 }
  0x35   : > { %p3591_p12 = pnand %p3589_p11, %p3530_p7  ;;  %p3596_p3 = por %p3595_p2, %p3594_p1 }
  0x37   : > { %p3592_p13 = pneg %p3591_p12 }
  0x39   : > { %p3597_p9 = pnand %p3596_p3, %p3592_p13 }
  0x3b   : > { %3600 = shalt.err (!%p3597_p9)
}
  0x3c   : > { %s3691_s20 = smov 512   ;;  %s3692_s29 = smov 256  }
  0x3d   : > { %s3693_s13 = smov 16   ;;  %s3230_s15 = sshll.u32 %s3688_s27, 8 }
  0x3e   : > { %3474 = dma.hbm_to_vmem [thread:$0]  (!%p3775_p5), %s257_s19, 24576, %s259_s18, %s247_s21, %s3691_s20, %s3692_s29, %s3693_s13  }
  0x3f   : > { %s4413_s6 = sshll.u32 %s3771_s9, 8  ;;  %s296_s4 = scalar_lea.hbm %s4400_s5, %s3230_s15 }
  0x40   : > { %s291_s8 = scalar_lea.vmem [#allocation7], %s4413_s6  ;;  %s297_s24 = sshll.u32 %s296_s4, 4  ;;  %s298_s24 = int_to_ptr.hbm [resolvable:$true] %s297_s24 }
  0x41   : > { %s299_s16 = sshll.u32 %s291_s8, 4  ;;  %s3616_s30 = sshra.s32 %s298_s24, 4  ;;  %s300_s16 = int_to_ptr.vmem [resolvable:$true] %s299_s16  ;;  %s3617_s30 = int_to_ptr.hbm [resolvable:$true] %s3616_s30 }
  0x42   : > { %s3618_s10 = scalar_lea.hbm %s3617_s30, 256  ;;  %s3623_s9 = scalar_lea.hbm %s4400_s5, 512 }
  0x43   : > { %p3619_p10 = scmp.ne.s32.totalorder %s3617_s30, %s3618_s10  ;;  %p3624_p13 = scmp.lt.s32.totalorder %s3617_s30, %s4400_s5 }
  0x44   : > { %p3625_p1 = scmp.lt.s32.totalorder %s3623_s9, %s3618_s10 }
  0x45   : > { %p3621_p11 = pnand %p3619_p10, %p3530_p7 }
  0x46   : > { %p3626_p2 = por %p3625_p1, %p3624_p13 }
  0x47   : > { %p3622_p12 = pneg %p3621_p11 }
  0x49   : > { %p3627_p3 = pnand %p3626_p2, %p3622_p12 }
  0x4b   : > { %3630 = shalt.err (!%p3627_p3)
}
  0x4c   : > { %s3694_s26 = smov 64   ;;  %s3695_s20 = smov 4  }
  0x4d   : > { %3480 = dma.hbm_to_vmem [thread:$0]  (!%p3775_p5), %s298_s24, 4096, %s300_s16, %s3785_s22, %s3694_s26, %s3694_s26, %s3695_s20  }
  0x4e   : > { %311 = sbr.rel (%p3819_p8) target bundleno = 578 (0x242), region = 48  ;;  %s313_s29 = sand.u32 (!%p3819_p8), 1, %s3680_s25  }
  0x4f   : > { %s3456_s13 = smul.u32 (!%p3819_p8), 1536, %s313_s29  ;;  %s314_s15 = scalar_lea.sflag (!%p3819_p8), [#allocation4], %s313_s29 }
  0x51   : > { %s3866_s6 = scalar_lea.vmem (!%p3819_p8), [#allocation3], %s3456_s13 }
  0x53   : > { %3663 = dma.done.wait (%p3812_p6), %s314_s15, 24576  }
  0x54   : > { %3665 = vsyncadd (%p3812_p6), %s314_s15, 4294942720  ;;  %s323_s8 = sand.u32 1, %s3802_s11   ;;  %s2326_s12 = sshll.u32 %s313_s29, 2 }
  0x55   : > { %s324_s22 = scalar_lea.sflag [#allocation6], %s323_s8  ;;  %s3873_s16 = scalar_lea.vmem [#allocation5], %s2326_s12 }
  0x56   : > { %3667 = dma.done.wait (%p3812_p6), %s324_s22, 4160  }
  0x57   : > { %3669 = vsyncadd (%p3812_p6), %s324_s22, 4294963136  ;;  %s2327_s23 = sshll.u32 %s313_s29, 8 }
  0x58   : > { %s3879_s14 = scalar_lea.vmem [#allocation7], %s2327_s23 }
  0x59   : > { %3671 = dma.done.wait (%p108_p0), [#allocation9], 16  }
  0x5a   : > { %3673 = vsyncadd (%p108_p0), [#allocation9], 4294967280  ;;  %385 = sbr.rel (%p2316_p4) target bundleno = 97 (0x61), region = 68 }
  0x5f   : > { %v3696_v0 = vmov 0.0  }
  0x60   : > { %386 = vst [vmem:[#allocation2] sm:$0xff] %v3696_v0 }
  0x61 PF: > { %v2444_v1 = vld [vmem:[%s3866_s6 + $0xe0] sm:$0xf]  ;;  %v3261_v2 = vld [vmem:[%s3866_s6 + $0xec] sm:$0xf0]  ;;  %p3226_p5 = scmp.ne.s32.totalorder %s3802_s11, 1 }
  0x62   : > { %v2572_v3 = vld [vmem:[%s3866_s6 + $0x1e0] sm:$0xf]  ;;  %v2445_v4 = vor.u32 %v3261_v2, %v2444_v1  ;;  %v3293_v5 = vld [vmem:[%s3866_s6 + $0x1ec] sm:$0xf0] }
  0x63   : > { %v2700_v6 = vld [vmem:[%s3866_s6 + $0x2e0] sm:$0xf]  ;;  %v3325_v7 = vld [vmem:[%s3866_s6 + $0x2ec] sm:$0xf0]  ;;  %v2573_v8 = vor.u32 %v3293_v5, %v2572_v3 }
  0x64   : > { %v2701_v9 = vor.u32 %v3325_v7, %v2700_v6  ;;  %v2828_v10 = vld [vmem:[%s3866_s6 + $0x3e0] sm:$0xf]  ;;  %v3357_v11 = vld [vmem:[%s3866_s6 + $0x3ec] sm:$0xf0]  ;;  %1584 = vmatpush.bf16.msra.mxu0 %v2445_v4 }
  0x65   : > { %v2428_v12 = vld [vmem:[%s3866_s6 + $0xc0] sm:$0xf]  ;;  %v2829_v13 = vor.u32 %v3357_v11, %v2828_v10  ;;  %v3257_v14 = vld [vmem:[%s3866_s6 + $0xcc] sm:$0xf0]  ;;  %1597 = vmatpush.bf16.msra.mxu1 %v2573_v8 }
  0x66   : > { %v2556_v15 = vld [vmem:[%s3866_s6 + $0x1c0] sm:$0xf]  ;;  %v3289_v16 = vld [vmem:[%s3866_s6 + $0x1cc] sm:$0xf0]  ;;  %1610 = vmatpush.bf16.msra.mxu2 %v2701_v9  ;;  %v2429_v17 = vor.u32 %v3257_v14, %v2428_v12 }
  0x67   : > { %v2557_v18 = vor.u32 %v3289_v16, %v2556_v15  ;;  %v2684_v19 = vld [vmem:[%s3866_s6 + $0x2c0] sm:$0xf]  ;;  %v3321_v20 = vld [vmem:[%s3866_s6 + $0x2cc] sm:$0xf0]  ;;  %1623 = vmatpush.bf16.msra.mxu3 %v2829_v13 }
  0x68   : > { %v2812_v21 = vld [vmem:[%s3866_s6 + $0x3c0] sm:$0xf]  ;;  %v2685_v22 = vor.u32 %v3321_v20, %v2684_v19  ;;  %v3353_v23 = vld [vmem:[%s3866_s6 + $0x3cc] sm:$0xf0]  ;;  %1585 = vmatpush.bf16.msra.mxu0 %v2429_v17 }
  0x69   : > { %v2412_v24 = vld [vmem:[%s3866_s6 + $0xa0] sm:$0xf]  ;;  %v3253_v25 = vld [vmem:[%s3866_s6 + $0xac] sm:$0xf0]  ;;  %v2813_v26 = vor.u32 %v3353_v23, %v2812_v21  ;;  %1598 = vmatpush.bf16.msra.mxu1 %v2557_v18 }
  0x6a   : > { %v2540_v27 = vld [vmem:[%s3866_s6 + $0x1a0] sm:$0xf]  ;;  %v3285_v28 = vld [vmem:[%s3866_s6 + $0x1ac] sm:$0xf0]  ;;  %v2413_v30 = vor.u32 %v3253_v25, %v2412_v24  ;;  %1611 = vmatpush.bf16.msra.mxu2 %v2685_v22 }
  0x6b   : > { %v2668_v29 = vld [vmem:[%s3866_s6 + $0x2a0] sm:$0xf]  ;;  %v3317_v31 = vld [vmem:[%s3866_s6 + $0x2ac] sm:$0xf0]  ;;  %v2541_v34 = vor.u32 %v3285_v28, %v2540_v27  ;;  %1624 = vmatpush.bf16.msra.mxu3 %v2813_v26 }
  0x6c   : > { %v2796_v32 = vld [vmem:[%s3866_s6 + $0x3a0] sm:$0xf]  ;;  %v3349_v33 = vld [vmem:[%s3866_s6 + $0x3ac] sm:$0xf0]  ;;  %v2669_v35 = vor.u32 %v3317_v31, %v2668_v29  ;;  %1586 = vmatpush.bf16.msra.mxu0 %v2413_v30 }
  0x6d   : > { %v2396_v36 = vld [vmem:[%s3866_s6 + $0x80] sm:$0xf]  ;;  %v3249_v37 = vld [vmem:[%s3866_s6 + $0x8c] sm:$0xf0]  ;;  %v2797_v39 = vor.u32 %v3349_v33, %v2796_v32  ;;  %1599 = vmatpush.bf16.msra.mxu1 %v2541_v34  ;;  %v3259_v34 = vld [vmem:[%s3866_s6 + $0xe4] sm:$0xf] }
  0x6e   : > { %v2524_v38 = vld [vmem:[%s3866_s6 + $0x180] sm:$0xf]  ;;  %v3281_v40 = vld [vmem:[%s3866_s6 + $0x18c] sm:$0xf0]  ;;  %v2397_v45 = vor.u32 %v3249_v37, %v2396_v36  ;;  %1612 = vmatpush.bf16.msra.mxu2 %v2669_v35  ;;  %v2446_v35 = vld [vmem:[%s3866_s6 + $0xf0] sm:$0xf0] }
  0x6f   : > { %v2652_v41 = vld [vmem:[%s3866_s6 + $0x280] sm:$0xf]  ;;  %v3313_v42 = vld [vmem:[%s3866_s6 + $0x28c] sm:$0xf0]  ;;  %v2525_v46 = vor.u32 %v3281_v40, %v2524_v38  ;;  %1625 = vmatpush.bf16.msra.mxu3 %v2797_v39  ;;  %v3291_v38 = vld [vmem:[%s3866_s6 + $0x1e4] sm:$0xf] }
  0x70   : > { %v2780_v43 = vld [vmem:[%s3866_s6 + $0x380] sm:$0xf]  ;;  %v3345_v44 = vld [vmem:[%s3866_s6 + $0x38c] sm:$0xf0]  ;;  %v2653_v47 = vor.u32 %v3313_v42, %v2652_v41  ;;  %1587 = vmatpush.bf16.msra.mxu0 %v2397_v45  ;;  %v2574_v39 = vld [vmem:[%s3866_s6 + $0x1f0] sm:$0xf0] }
  0x71   : > { %v2380_v48 = vld [vmem:[%s3866_s6 + $0x60] sm:$0xf]  ;;  %v3245_v49 = vld [vmem:[%s3866_s6 + $0x6c] sm:$0xf0]  ;;  %v2781_v51 = vor.u32 %v3345_v44, %v2780_v43  ;;  %1600 = vmatpush.bf16.msra.mxu1 %v2525_v46  ;;  %v2449_v43 = vor.u32 %v3259_v34, %v2446_v35  ;;  %v393_v34 = vld [vmem:[%s4395_s0 + $0x10] sm:$0xff] }
  0x72   : > { %v2508_v50 = vld [vmem:[%s3866_s6 + $0x160] sm:$0xf]  ;;  %v3277_v52 = vld [vmem:[%s3866_s6 + $0x16c] sm:$0xf0]  ;;  %v2381_v57 = vor.u32 %v3245_v49, %v2380_v48  ;;  %1613 = vmatpush.bf16.msra.mxu2 %v2653_v47  ;;  %v2577_v47 = vor.u32 %v3291_v38, %v2574_v39  ;;  %v3255_v49 = vld [vmem:[%s3866_s6 + $0xc4] sm:$0xf] }
  0x73   : > { %v2636_v53 = vld [vmem:[%s3866_s6 + $0x260] sm:$0xf]  ;;  %v3309_v54 = vld [vmem:[%s3866_s6 + $0x26c] sm:$0xf0]  ;;  %v2509_v58 = vor.u32 %v3277_v52, %v2508_v50  ;;  %1626 = vmatpush.bf16.msra.mxu3 %v2781_v51  ;;  %v2430_v50 = vld [vmem:[%s3866_s6 + $0xd0] sm:$0xf0] }
  0x74   : > { %v2764_v55 = vld [vmem:[%s3866_s6 + $0x360] sm:$0xf]  ;;  %v3341_v56 = vld [vmem:[%s3866_s6 + $0x36c] sm:$0xf0]  ;;  %v2637_v59 = vor.u32 %v3309_v54, %v2636_v53  ;;  %1588 = vmatpush.bf16.msra.mxu0 %v2381_v57  ;;  %v3287_v51 = vld [vmem:[%s3866_s6 + $0x1c4] sm:$0xf] }
  0x75   : > { %v2364_v60 = vld [vmem:[%s3866_s6 + $0x40] sm:$0xf]  ;;  %v3241_v61 = vld [vmem:[%s3866_s6 + $0x4c] sm:$0xf0]  ;;  %v2765_v63 = vor.u32 %v3341_v56, %v2764_v55  ;;  %1601 = vmatpush.bf16.msra.mxu1 %v2509_v58  ;;  %v2558_v52 = vld [vmem:[%s3866_s6 + $0x1d0] sm:$0xf0]  ;;  %v2433_v55 = vor.u32 %v3255_v49, %v2430_v50 }
  0x76   : > { %v2492_v62 = vld [vmem:[%s3866_s6 + $0x140] sm:$0xf]  ;;  %v3273_v0 = vld [vmem:[%s3866_s6 + $0x14c] sm:$0xf0]  ;;  %v2365_v5 = vor.u32 %v3241_v61, %v2364_v60  ;;  %1614 = vmatpush.bf16.msra.mxu2 %v2637_v59  ;;  %v2561_v59 = vor.u32 %v3287_v51, %v2558_v52  ;;  %v3251_v61 = vld [vmem:[%s3866_s6 + $0xa4] sm:$0xf] }
  0x77   : > { %v2620_v1 = vld [vmem:[%s3866_s6 + $0x240] sm:$0xf]  ;;  %v3305_v2 = vld [vmem:[%s3866_s6 + $0x24c] sm:$0xf0]  ;;  %v2493_v6 = vor.u32 %v3273_v0, %v2492_v62  ;;  %1627 = vmatpush.bf16.msra.mxu3 %v2765_v63  ;;  %v2414_v62 = vld [vmem:[%s3866_s6 + $0xb0] sm:$0xf0] }
  0x78   : > { %v2748_v3 = vld [vmem:[%s3866_s6 + $0x340] sm:$0xf]  ;;  %v3337_v4 = vld [vmem:[%s3866_s6 + $0x34c] sm:$0xf0]  ;;  %v2621_v7 = vor.u32 %v3305_v2, %v2620_v1  ;;  %1589 = vmatpush.bf16.msra.mxu0 %v2365_v5  ;;  %v3283_v63 = vld [vmem:[%s3866_s6 + $0x1a4] sm:$0xf]  ;;  %v2417_v5 = vor.u32 %v3251_v61, %v2414_v62 }
  0x79   : > { %v2348_v8 = vld [vmem:[%s3866_s6 + $0x20] sm:$0xf]  ;;  %v3237_v9 = vld [vmem:[%s3866_s6 + $0x2c] sm:$0xf0]  ;;  %v2749_v11 = vor.u32 %v3337_v4, %v2748_v3  ;;  %1602 = vmatpush.bf16.msra.mxu1 %v2493_v6  ;;  %v2542_v0 = vld [vmem:[%s3866_s6 + $0x1b0] sm:$0xf0] }
  0x7a   : > { %v2476_v10 = vld [vmem:[%s3866_s6 + $0x120] sm:$0xf]  ;;  %v3269_v12 = vld [vmem:[%s3866_s6 + $0x12c] sm:$0xf0]  ;;  %v2349_v17 = vor.u32 %v3237_v9, %v2348_v8  ;;  %1615 = vmatpush.bf16.msra.mxu2 %v2621_v7  ;;  %v387_v2 = vld [vmem:[%s4396_s1] sm:$0x3f] }
  0x7b   : > { %v2604_v13 = vld [vmem:[%s3866_s6 + $0x220] sm:$0xf]  ;;  %v3301_v14 = vld [vmem:[%s3866_s6 + $0x22c] sm:$0xf0]  ;;  %v2477_v20 = vor.u32 %v3269_v12, %v2476_v10  ;;  %1628 = vmatpush.bf16.msra.mxu3 %v2749_v11  ;;  %v388_v3 = vld [vmem:[%s4397_s2] sm:$0x3f]  ;;  %v2545_v10 = vor.u32 %v3283_v63, %v2542_v0 }
  0x7c   : > { %v2732_v15 = vld [vmem:[%s3866_s6 + $0x320] sm:$0xf]  ;;  %v3333_v16 = vld [vmem:[%s3866_s6 + $0x32c] sm:$0xf0]  ;;  %v2605_v21 = vor.u32 %v3301_v14, %v2604_v13  ;;  %1590 = vmatpush.bf16.msra.mxu0 %v2349_v17  ;;  %v389_v9 = vmul.f32 %v388_v3, %v387_v2  ;;  %v3247_v12 = vld [vmem:[%s3866_s6 + $0x84] sm:$0xf] }
  0x7d   : > { %v2332_v18 = vld [vmem:[%s3866_s6] sm:$0xf]  ;;  %v3233_v19 = vld [vmem:[%s3866_s6 + $0xc] sm:$0xf0]  ;;  %v2733_v25 = vor.u32 %v3333_v16, %v2732_v15  ;;  %1603 = vmatpush.bf16.msra.mxu1 %v2477_v20  ;;  %v2398_v13 = vld [vmem:[%s3866_s6 + $0x90] sm:$0xf0] }
  0x7e   : > { %v2460_v22 = vld [vmem:[%s3866_s6 + $0x100] sm:$0xf]  ;;  %v3265_v23 = vld [vmem:[%s3866_s6 + $0x10c] sm:$0xf0]  ;;  %v2333_v32 = vor.u32 %v3233_v19, %v2332_v18  ;;  %1616 = vmatpush.bf16.msra.mxu2 %v2605_v21  ;;  %v3279_v14 = vld [vmem:[%s3866_s6 + $0x184] sm:$0xf]  ;;  %3523 = vtanh.f32 %v389_v9  ;;  %v2401_v20 = vor.u32 %v3247_v12, %v2398_v13 }
  0x7f   : > { %v2588_v24 = vld [vmem:[%s3866_s6 + $0x200] sm:$0xf]  ;;  %v3297_v26 = vld [vmem:[%s3866_s6 + $0x20c] sm:$0xf0]  ;;  %v2461_v36 = vor.u32 %v3265_v23, %v2460_v22  ;;  %1629 = vmatpush.bf16.msra.mxu3 %v2733_v25  ;;  %v2526_v15 = vld [vmem:[%s3866_s6 + $0x190] sm:$0xf0] }
  0x80   : > { %v2716_v27 = vld [vmem:[%s3866_s6 + $0x300] sm:$0xf]  ;;  %v3329_v28 = vld [vmem:[%s3866_s6 + $0x30c] sm:$0xf0]  ;;  %v2589_v37 = vor.u32 %v3297_v26, %v2588_v24  ;;  %1591 = vmatpush.bf16.msra.mxu0 %v2333_v32  ;;  %v3243_v23 = vld [vmem:[%s3866_s6 + $0x64] sm:$0xf]  ;;  %v2529_v24 = vor.u32 %v3279_v14, %v2526_v15 }
  0x81   : > { %v2956_v29 = vld [vmem:[%s3866_s6 + $0x4e0] sm:$0xf]  ;;  %v3389_v30 = vld [vmem:[%s3866_s6 + $0x4ec] sm:$0xf0]  ;;  %v2717_v40 = vor.u32 %v3329_v28, %v2716_v27  ;;  %1604 = vmatpush.bf16.msra.mxu1 %v2461_v36  ;;  %v2382_v25 = vld [vmem:[%s3866_s6 + $0x70] sm:$0xf0] }
  0x82   : > { %v3084_v31 = vld [vmem:[%s3866_s6 + $0x5e0] sm:$0xf]  ;;  %v3421_v33 = vld [vmem:[%s3866_s6 + $0x5ec] sm:$0xf0]  ;;  %v2957_v41 = vor.u32 %v3389_v30, %v2956_v29  ;;  %1617 = vmatpush.bf16.msra.mxu2 %v2589_v37  ;;  %v3275_v26 = vld [vmem:[%s3866_s6 + $0x164] sm:$0xf]  ;;  %v2385_v37 = vor.u32 %v3243_v23, %v2382_v25 }
  0x83   : > { %v3085_v42 = vor.u32 %v3421_v33, %v3084_v31  ;;  %v2940_v44 = vld [vmem:[%s3866_s6 + $0x4c0] sm:$0xf]  ;;  %v3385_v45 = vld [vmem:[%s3866_s6 + $0x4cc] sm:$0xf0]  ;;  %1630 = vmatpush.bf16.msra.mxu3 %v2717_v40  ;;  %v2510_v27 = vld [vmem:[%s3866_s6 + $0x170] sm:$0xf0] }
  0x84   : > { %v3068_v46 = vld [vmem:[%s3866_s6 + $0x5c0] sm:$0xf]  ;;  %v3417_v48 = vld [vmem:[%s3866_s6 + $0x5cc] sm:$0xf0]  ;;  %1636 = vmatpush.bf16.msrb.mxu0 %v2957_v41  ;;  %v2941_v53 = vor.u32 %v3385_v45, %v2940_v44  ;;  %v3239_v33 = vld [vmem:[%s3866_s6 + $0x44] sm:$0xf]  ;;  %v4005_v35 = vpop.eup %3523  ;;  %v2513_v38 = vor.u32 %v3275_v26, %v2510_v27 }
  0x85   : > { %1649 = vmatpush.bf16.msrb.mxu1 %v3085_v42  ;;  %v3069_v54 = vor.u32 %v3417_v48, %v3068_v46  ;;  %v2924_v56 = vld [vmem:[%s3866_s6 + $0x4a0] sm:$0xf]  ;;  %v3381_v57 = vld [vmem:[%s3866_s6 + $0x4ac] sm:$0xf0]  ;;  %v391_v39 = vld [vmem:[%s4395_s0] sm:$0xff]  ;;  %v398_v44 = vperm.slane %v4005_v35, 0 }
  0x86   : > { %1662 = vmatpush.bf16.msrb.mxu2 %v2449_v43  ;;  %v3052_v58 = vld [vmem:[%s3866_s6 + $0x5a0] sm:$0xf]  ;;  %v3413_v60 = vld [vmem:[%s3866_s6 + $0x5ac] sm:$0xf0]  ;;  %v2925_v1 = vor.u32 %v3381_v57, %v2924_v56  ;;  %v2366_v42 = vld [vmem:[%s3866_s6 + $0x50] sm:$0xf0] }
  0x87   : > { %1675 = vmatpush.bf16.msrb.mxu3 %v2577_v47  ;;  %v3053_v4 = vor.u32 %v3413_v60, %v3052_v58  ;;  %v2908_v6 = vld [vmem:[%s3866_s6 + $0x480] sm:$0xf]  ;;  %v3377_v7 = vld [vmem:[%s3866_s6 + $0x48c] sm:$0xf0]  ;;  %v400_v43 = vperm.slane %v4005_v35, 2  ;;  %v401_v45 = vperm.slane %v4005_v35, 3  ;;  %v410_v51 = vadd.f32 %v398_v44, %v391_v39 }
  0x88   : > { %1637 = vmatpush.bf16.msrb.mxu0 %v2941_v53  ;;  %v3036_v8 = vld [vmem:[%s3866_s6 + $0x580] sm:$0xf]  ;;  %v3409_v11 = vld [vmem:[%s3866_s6 + $0x58c] sm:$0xf0]  ;;  %v2909_v16 = vor.u32 %v3377_v7, %v2908_v6  ;;  %v399_v46 = vperm.slane %v4005_v35, 1  ;;  %v403_v44 = vperm.slane %v4005_v35, 5 }
  0x89   : > { %1650 = vmatpush.bf16.msrb.mxu1 %v3069_v54  ;;  %v2892_v17 = vld [vmem:[%s3866_s6 + $0x460] sm:$0xf]  ;;  %v3373_v18 = vld [vmem:[%s3866_s6 + $0x46c] sm:$0xf0]  ;;  %v3037_v19 = vor.u32 %v3409_v11, %v3036_v8  ;;  %v3271_v48 = vld [vmem:[%s3866_s6 + $0x144] sm:$0xf]  ;;  %v412_v50 = vadd.f32 %v400_v43, %v393_v34  ;;  %v4028_v61 = vpack.c.bf16 %v410_v51, %v410_v51 }
  0x8a   : > { %1663 = vmatpush.bf16.msrb.mxu2 %v2433_v55  ;;  %v3020_v21 = vld [vmem:[%s3866_s6 + $0x560] sm:$0xf]  ;;  %v3405_v22 = vld [vmem:[%s3866_s6 + $0x56c] sm:$0xf0]  ;;  %v2893_v30 = vor.u32 %v3373_v18, %v2892_v17  ;;  %v2494_v49 = vld [vmem:[%s3866_s6 + $0x150] sm:$0xf0]  ;;  %v2369_v55 = vor.u32 %v3239_v33, %v2366_v42 }
  0x8b   : > { %1676 = vmatpush.bf16.msrb.mxu3 %v2561_v59  ;;  %v2876_v28 = vld [vmem:[%s3866_s6 + $0x440] sm:$0xf]  ;;  %v3369_v29 = vld [vmem:[%s3866_s6 + $0x44c] sm:$0xf0]  ;;  %v3021_v36 = vor.u32 %v3405_v22, %v3020_v21  ;;  %v2497_v59 = vor.u32 %v3271_v48, %v2494_v49  ;;  %v4026_v60 = vpack.c.bf16 %v412_v50, %v412_v50  ;;  %v3235_v63 = vld [vmem:[%s3866_s6 + $0x24] sm:$0xf]  ;;  %1592 = vmatmul.bf16.vlgmr.msra.gmra.mxu0 %v4028_v61 }
  0x8c   : > { %1638 = vmatpush.bf16.msrb.mxu0 %v2925_v1  ;;  %v3004_v31 = vld [vmem:[%s3866_s6 + $0x540] sm:$0xf]  ;;  %v3401_v32 = vld [vmem:[%s3866_s6 + $0x54c] sm:$0xf0]  ;;  %v2877_v47 = vor.u32 %v3369_v29, %v2876_v28  ;;  %v2350_v0 = vld [vmem:[%s3866_s6 + $0x30] sm:$0xf0] }
  0x8d   : > { %1651 = vmatpush.bf16.msrb.mxu1 %v3053_v4  ;;  %v394_v40 = vld [vmem:[%s4395_s0 + $0x18] sm:$0xff]  ;;  %v392_v41 = vld [vmem:[%s4395_s0 + $0x8] sm:$0xff]  ;;  %v3005_v54 = vor.u32 %v3401_v32, %v3004_v31  ;;  %1618 = vmatmul.bf16.vlgmr.msra.gmra.mxu2 %v4026_v60  ;;  %v2353_v9 = vor.u32 %v3235_v63, %v2350_v0  ;;  %v395_v43 = vld [vmem:[%s4395_s0 + $0x20] sm:$0xff] }
  0x8e   : > { %1664 = vmatpush.bf16.msrb.mxu2 %v2417_v5  ;;  %v413_v52 = vadd.f32 %v401_v45, %v394_v40  ;;  %v411_v53 = vadd.f32 %v399_v46, %v392_v41  ;;  %v2860_v56 = vld [vmem:[%s3866_s6 + $0x420] sm:$0xf]  ;;  %v3365_v57 = vld [vmem:[%s3866_s6 + $0x42c] sm:$0xf0]  ;;  %v3267_v2 = vld [vmem:[%s3866_s6 + $0x124] sm:$0xf] }
  0x8f   : > { %1677 = vmatpush.bf16.msrb.mxu3 %v2545_v10  ;;  %v2988_v58 = vld [vmem:[%s3866_s6 + $0x520] sm:$0xf]  ;;  %v3397_v62 = vld [vmem:[%s3866_s6 + $0x52c] sm:$0xf0]  ;;  %v2478_v3 = vld [vmem:[%s3866_s6 + $0x130] sm:$0xf0]  ;;  %v2861_v5 = vor.u32 %v3365_v57, %v2860_v56 }
  0x90   : > { %1639 = vmatpush.bf16.msrb.mxu0 %v2909_v16  ;;  %v4033_v1 = vpack.c.bf16 %v413_v52, %v413_v52  ;;  %v4037_v4 = vpack.c.bf16 %v411_v53, %v411_v53  ;;  %v2844_v6 = vld [vmem:[%s3866_s6 + $0x400] sm:$0xf]  ;;  %v3361_v7 = vld [vmem:[%s3866_s6 + $0x40c] sm:$0xf0]  ;;  %v2989_v8 = vor.u32 %v3397_v62, %v2988_v58  ;;  %v3231_v12 = vld [vmem:[%s3866_s6 + $0x4] sm:$0xf]  ;;  %v2481_v13 = vor.u32 %v3267_v2, %v2478_v3 }
  0x91   : > { %1652 = vmatpush.bf16.msrb.mxu1 %v3037_v19  ;;  %v2972_v10 = vld [vmem:[%s3866_s6 + $0x500] sm:$0xf]  ;;  %v3393_v11 = vld [vmem:[%s3866_s6 + $0x50c] sm:$0xf0]  ;;  %v2334_v14 = vld [vmem:[%s3866_s6 + $0x10] sm:$0xf0] }
  0x92   : > { %1665 = vmatpush.bf16.msrb.mxu2 %v2401_v20  ;;  %v3263_v15 = vld [vmem:[%s3866_s6 + $0x104] sm:$0xf]  ;;  %v2462_v16 = vld [vmem:[%s3866_s6 + $0x110] sm:$0xf0]  ;;  %1631 = vmatmul.bf16.vlgmr.msra.gmra.mxu3 %v4033_v1  ;;  %v2845_v20 = vor.u32 %v3361_v7, %v2844_v6  ;;  %v2337_v25 = vor.u32 %v3231_v12, %v2334_v14  ;;  %v402_v40 = vperm.slane %v4005_v35, 4 }
  0x93   : > { %1678 = vmatpush.bf16.msrb.mxu3 %v2529_v24  ;;  %1605 = vmatmul.bf16.vlgmr.msra.gmra.mxu1 %v4037_v4  ;;  %v3323_v17 = vld [vmem:[%s3866_s6 + $0x2e4] sm:$0xf]  ;;  %v2702_v18 = vld [vmem:[%s3866_s6 + $0x2f0] sm:$0xf0]  ;;  %v2973_v24 = vor.u32 %v3393_v11, %v2972_v10  ;;  %v2465_v28 = vor.u32 %v3263_v15, %v2462_v16 }
  0x94   : > { %1640 = vmatpush.bf16.msrb.mxu0 %v2893_v30  ;;  %v3355_v19 = vld [vmem:[%s3866_s6 + $0x3e4] sm:$0xf]  ;;  %v2830_v21 = vld [vmem:[%s3866_s6 + $0x3f0] sm:$0xf0]  ;;  %v2705_v29 = vor.u32 %v3323_v17, %v2702_v18 }
  0x95   : > { %1653 = vmatpush.bf16.msrb.mxu1 %v3021_v36  ;;  %v3387_v22 = vld [vmem:[%s3866_s6 + $0x4e4] sm:$0xf]  ;;  %v2958_v23 = vld [vmem:[%s3866_s6 + $0x4f0] sm:$0xf0]  ;;  %v2833_v31 = vor.u32 %v3355_v19, %v2830_v21 }
  0x96   : > { %1666 = vmatpush.bf16.msrb.mxu2 %v2385_v37  ;;  %v3419_v26 = vld [vmem:[%s3866_s6 + $0x5e4] sm:$0xf]  ;;  %v3086_v27 = vld [vmem:[%s3866_s6 + $0x5f0] sm:$0xf0]  ;;  %v2961_v32 = vor.u32 %v3387_v22, %v2958_v23 }
  0x97   : > { %1679 = vmatpush.bf16.msrb.mxu3 %v2513_v38  ;;  %v3319_v30 = vld [vmem:[%s3866_s6 + $0x2c4] sm:$0xf]  ;;  %v2686_v33 = vld [vmem:[%s3866_s6 + $0x2d0] sm:$0xf0]  ;;  %v3089_v37 = vor.u32 %v3419_v26, %v3086_v27 }
  0x98   : > { %1641 = vmatpush.bf16.msrb.mxu0 %v2877_v47  ;;  %v3351_v34 = vld [vmem:[%s3866_s6 + $0x3c4] sm:$0xf]  ;;  %v2814_v36 = vld [vmem:[%s3866_s6 + $0x3d0] sm:$0xf0]  ;;  %v2689_v45 = vor.u32 %v3319_v30, %v2686_v33 }
  0x99   : > { %1654 = vmatpush.bf16.msrb.mxu1 %v3005_v54  ;;  %v3383_v38 = vld [vmem:[%s3866_s6 + $0x4c4] sm:$0xf]  ;;  %v2942_v39 = vld [vmem:[%s3866_s6 + $0x4d0] sm:$0xf0]  ;;  %v2817_v47 = vor.u32 %v3351_v34, %v2814_v36 }
  0x9a   : > { %1667 = vmatpush.bf16.msrb.mxu2 %v2369_v55  ;;  %v3415_v41 = vld [vmem:[%s3866_s6 + $0x5c4] sm:$0xf]  ;;  %v3070_v42 = vld [vmem:[%s3866_s6 + $0x5d0] sm:$0xf0]  ;;  %v2945_v48 = vor.u32 %v3383_v38, %v2942_v39  ;;  %v414_v55 = vadd.f32 %v402_v40, %v395_v43 }
  0x9b   : > { %1680 = vmatpush.bf16.msrb.mxu3 %v2497_v59  ;;  %v396_v46 = vld [vmem:[%s4395_s0 + $0x28] sm:$0xff]  ;;  %v2670_v50 = vld [vmem:[%s3866_s6 + $0x2b0] sm:$0xf0]  ;;  %v3073_v35 = vor.u32 %v3415_v41, %v3070_v42 }
  0x9c   : > { %1642 = vmatpush.bf16.msrb.mxu0 %v2861_v5  ;;  %v3315_v49 = vld [vmem:[%s3866_s6 + $0x2a4] sm:$0xf]  ;;  %v2798_v52 = vld [vmem:[%s3866_s6 + $0x3b0] sm:$0xf0]  ;;  %v415_v58 = vadd.f32 %v403_v44, %v396_v46  ;;  %v4086_v6 = vpack.c.bf16 %v414_v55, %v414_v55 }
  0x9d   : > { %1655 = vmatpush.bf16.msrb.mxu1 %v2989_v8  ;;  %v3347_v51 = vld [vmem:[%s3866_s6 + $0x3a4] sm:$0xf]  ;;  %v2926_v54 = vld [vmem:[%s3866_s6 + $0x4b0] sm:$0xf0]  ;;  %v2673_v59 = vor.u32 %v3315_v49, %v2670_v50 }
  0x9e   : > { %1668 = vmatpush.bf16.msrb.mxu2 %v2353_v9  ;;  %v3379_v53 = vld [vmem:[%s3866_s6 + $0x4a4] sm:$0xf]  ;;  %v3054_v57 = vld [vmem:[%s3866_s6 + $0x5b0] sm:$0xf0]  ;;  %v2801_v62 = vor.u32 %v3347_v51, %v2798_v52  ;;  %v4092_v10 = vpack.c.bf16 %v415_v58, %v415_v58 }
  0x9f   : > { %1681 = vmatpush.bf16.msrb.mxu3 %v2481_v13  ;;  %v3411_v56 = vld [vmem:[%s3866_s6 + $0x5a4] sm:$0xf]  ;;  %v2929_v63 = vor.u32 %v3379_v53, %v2926_v54  ;;  %v2654_v2 = vld [vmem:[%s3866_s6 + $0x290] sm:$0xf0] }
  0xa0   : > { %1643 = vmatpush.bf16.msrb.mxu0 %v2845_v20  ;;  %v3311_v0 = vld [vmem:[%s3866_s6 + $0x284] sm:$0xf]  ;;  %v3057_v5 = vor.u32 %v3411_v56, %v3054_v57  ;;  %v2782_v7 = vld [vmem:[%s3866_s6 + $0x390] sm:$0xf0] }
  0xa1   : > { %1656 = vmatpush.bf16.msrb.mxu1 %v2973_v24  ;;  %v3343_v3 = vld [vmem:[%s3866_s6 + $0x384] sm:$0xf]  ;;  %v2910_v9 = vld [vmem:[%s3866_s6 + $0x490] sm:$0xf0]  ;;  %v2657_v13 = vor.u32 %v3311_v0, %v2654_v2  ;;  %v3262_v0 = vld [vmem:[%s3866_s6 + $0xf4] sm:$0xf0] }
  0xa2   : > { %1669 = vmatpush.bf16.msrb.mxu2 %v2337_v25  ;;  %v3375_v8 = vld [vmem:[%s3866_s6 + $0x484] sm:$0xf]  ;;  %v3038_v12 = vld [vmem:[%s3866_s6 + $0x590] sm:$0xf0]  ;;  %v2785_v14 = vor.u32 %v3343_v3, %v2782_v7  ;;  %v2580_v2 = vld [vmem:[%s3866_s6 + $0x1e8] sm:$0xf] }
  0xa3   : > { %1682 = vmatpush.bf16.msrb.mxu3 %v2465_v28  ;;  %v3407_v11 = vld [vmem:[%s3866_s6 + $0x584] sm:$0xf]  ;;  %v2913_v15 = vor.u32 %v3375_v8, %v2910_v9  ;;  %v2638_v17 = vld [vmem:[%s3866_s6 + $0x270] sm:$0xf0]  ;;  %1644 = vmatmul.bf16.vlgmr.msrb.gmra.mxu0 %v4086_v6  ;;  %v2708_v7 = vld [vmem:[%s3866_s6 + $0x2e8] sm:$0xf] }
  0xa4   : > { %1688 = vmatpush.bf16.msra.mxu0 %v2705_v29  ;;  %v3307_v16 = vld [vmem:[%s3866_s6 + $0x264] sm:$0xf]  ;;  %v3041_v19 = vor.u32 %v3407_v11, %v3038_v12  ;;  %v2766_v20 = vld [vmem:[%s3866_s6 + $0x370] sm:$0xf0]  ;;  %1657 = vmatmul.bf16.vlgmr.msrb.gmra.mxu1 %v4092_v10  ;;  %v3326_v8 = vld [vmem:[%s3866_s6 + $0x2f4] sm:$0xf0] }
  0xa5   : > { %1701 = vmatpush.bf16.msra.mxu1 %v2833_v31  ;;  %1670 = vmatmul.bf16.vlgmr.msrb.gmra.mxu2 %v4028_v61  ;;  %v3339_v18 = vld [vmem:[%s3866_s6 + $0x364] sm:$0xf]  ;;  %v2894_v22 = vld [vmem:[%s3866_s6 + $0x470] sm:$0xf0]  ;;  %v2641_v25 = vor.u32 %v3307_v16, %v2638_v17  ;;  %v2836_v12 = vld [vmem:[%s3866_s6 + $0x3e8] sm:$0xf]  ;;  %v2709_v17 = vor.u32 %v3326_v8, %v2708_v7 }
  0xa6   : > { %1714 = vmatpush.bf16.msra.mxu2 %v2961_v32  ;;  %v3371_v21 = vld [vmem:[%s3866_s6 + $0x464] sm:$0xf]  ;;  %v3022_v24 = vld [vmem:[%s3866_s6 + $0x570] sm:$0xf0]  ;;  %1683 = vmatmul.bf16.vlgmr.msrb.gmra.mxu3 %v4037_v4  ;;  %v2769_v26 = vor.u32 %v3339_v18, %v2766_v20  ;;  %v2436_v18 = vld [vmem:[%s3866_s6 + $0xc8] sm:$0xf] }
  0xa7   : > { %1727 = vmatpush.bf16.msra.mxu3 %v3089_v37  ;;  %v3403_v23 = vld [vmem:[%s3866_s6 + $0x564] sm:$0xf]  ;;  %v2897_v27 = vor.u32 %v3371_v21, %v2894_v22  ;;  %v2622_v29 = vld [vmem:[%s3866_s6 + $0x250] sm:$0xf0]  ;;  %v2564_v20 = vld [vmem:[%s3866_s6 + $0x1c8] sm:$0xf] }
  0xa8   : > { %1689 = vmatpush.bf16.msra.mxu0 %v2689_v45  ;;  %v3303_v28 = vld [vmem:[%s3866_s6 + $0x244] sm:$0xf]  ;;  %v3025_v31 = vor.u32 %v3403_v23, %v3022_v24  ;;  %v2750_v32 = vld [vmem:[%s3866_s6 + $0x350] sm:$0xf0]  ;;  %v3290_v22 = vld [vmem:[%s3866_s6 + $0x1d4] sm:$0xf0] }
  0xa9   : > { %1702 = vmatpush.bf16.msra.mxu1 %v2817_v47  ;;  %v3335_v30 = vld [vmem:[%s3866_s6 + $0x344] sm:$0xf]  ;;  %v2878_v34 = vld [vmem:[%s3866_s6 + $0x450] sm:$0xf0]  ;;  %v2625_v38 = vor.u32 %v3303_v28, %v2622_v29  ;;  %v2692_v23 = vld [vmem:[%s3866_s6 + $0x2c8] sm:$0xf]  ;;  %v2565_v28 = vor.u32 %v3290_v22, %v2564_v20 }
  0xaa   : > { %1715 = vmatpush.bf16.msra.mxu2 %v2945_v48  ;;  %v3367_v33 = vld [vmem:[%s3866_s6 + $0x444] sm:$0xf]  ;;  %v3006_v37 = vld [vmem:[%s3866_s6 + $0x550] sm:$0xf0]  ;;  %v2753_v39 = vor.u32 %v3335_v30, %v2750_v32  ;;  %v3322_v24 = vld [vmem:[%s3866_s6 + $0x2d4] sm:$0xf0] }
  0xab   : > { %1728 = vmatpush.bf16.msra.mxu3 %v3073_v35  ;;  %v3399_v36 = vld [vmem:[%s3866_s6 + $0x544] sm:$0xf]  ;;  %v2881_v40 = vor.u32 %v3367_v33, %v2878_v34  ;;  %v2606_v42 = vld [vmem:[%s3866_s6 + $0x230] sm:$0xf0]  ;;  %v2693_v29 = vor.u32 %v3322_v24, %v2692_v23  ;;  %v2420_v30 = vld [vmem:[%s3866_s6 + $0xa8] sm:$0xf] }
  0xac   : > { %1690 = vmatpush.bf16.msra.mxu0 %v2673_v59  ;;  %v3299_v41 = vld [vmem:[%s3866_s6 + $0x224] sm:$0xf]  ;;  %v3009_v44 = vor.u32 %v3399_v36, %v3006_v37  ;;  %v2734_v45 = vld [vmem:[%s3866_s6 + $0x330] sm:$0xf0]  ;;  %v2548_v32 = vld [vmem:[%s3866_s6 + $0x1a8] sm:$0xf] }
  0xad   : > { %1703 = vmatpush.bf16.msra.mxu1 %v2801_v62  ;;  %v3331_v43 = vld [vmem:[%s3866_s6 + $0x324] sm:$0xf]  ;;  %v2862_v47 = vld [vmem:[%s3866_s6 + $0x430] sm:$0xf0]  ;;  %v2609_v50 = vor.u32 %v3299_v41, %v2606_v42  ;;  %v3286_v34 = vld [vmem:[%s3866_s6 + $0x1b4] sm:$0xf0] }
  0xae   : > { %1716 = vmatpush.bf16.msra.mxu2 %v2929_v63  ;;  %v3363_v46 = vld [vmem:[%s3866_s6 + $0x424] sm:$0xf]  ;;  %v2990_v49 = vld [vmem:[%s3866_s6 + $0x530] sm:$0xf0]  ;;  %v2737_v52 = vor.u32 %v3331_v43, %v2734_v45  ;;  %v2452_v63 = vld [vmem:[%s3866_s6 + $0xe8] sm:$0xf]  ;;  %v2549_v41 = vor.u32 %v3286_v34, %v2548_v32 }
  0xaf   : > { %1729 = vmatpush.bf16.msra.mxu3 %v3057_v5  ;;  %v3395_v48 = vld [vmem:[%s3866_s6 + $0x524] sm:$0xf]  ;;  %v2590_v35 = vld [vmem:[%s3866_s6 + $0x210] sm:$0xf0]  ;;  %v2865_v53 = vor.u32 %v3363_v46, %v2862_v47  ;;  %v3294_v5 = vld [vmem:[%s3866_s6 + $0x1f4] sm:$0xf0] }
  0xb0   : > { %1691 = vmatpush.bf16.msra.mxu0 %v2657_v13  ;;  %v3295_v51 = vld [vmem:[%s3866_s6 + $0x204] sm:$0xf]  ;;  %v2718_v55 = vld [vmem:[%s3866_s6 + $0x310] sm:$0xf0]  ;;  %v2993_v57 = vor.u32 %v3395_v48, %v2990_v49  ;;  %v3358_v13 = vld [vmem:[%s3866_s6 + $0x3f4] sm:$0xf0]  ;;  %v2581_v16 = vor.u32 %v3294_v5, %v2580_v2 }
  0xb1   : > { %1704 = vmatpush.bf16.msra.mxu1 %v2785_v14  ;;  %v3327_v54 = vld [vmem:[%s3866_s6 + $0x304] sm:$0xf]  ;;  %v2846_v58 = vld [vmem:[%s3866_s6 + $0x410] sm:$0xf0]  ;;  %v2593_v3 = vor.u32 %v3295_v51, %v2590_v35  ;;  %v2837_v21 = vor.u32 %v3358_v13, %v2836_v12  ;;  %v2676_v36 = vld [vmem:[%s3866_s6 + $0x2a8] sm:$0xf] }
  0xb2   : > { %1717 = vmatpush.bf16.msra.mxu2 %v2913_v15  ;;  %v3359_v56 = vld [vmem:[%s3866_s6 + $0x404] sm:$0xf]  ;;  %v2974_v62 = vld [vmem:[%s3866_s6 + $0x510] sm:$0xf0]  ;;  %v2721_v9 = vor.u32 %v3327_v54, %v2718_v55  ;;  %v2453_v15 = vor.u32 %v3262_v0, %v2452_v63  ;;  %v3318_v37 = vld [vmem:[%s3866_s6 + $0x2b4] sm:$0xf0] }
  0xb3   : > { %1730 = vmatpush.bf16.msra.mxu3 %v3041_v19  ;;  %v3391_v59 = vld [vmem:[%s3866_s6 + $0x504] sm:$0xf]  ;;  %v2849_v11 = vor.u32 %v3359_v56, %v2846_v58  ;;  %v3258_v19 = vld [vmem:[%s3866_s6 + $0xd4] sm:$0xf0]  ;;  %v2677_v42 = vor.u32 %v3318_v37, %v2676_v36  ;;  %v2404_v43 = vld [vmem:[%s3866_s6 + $0x88] sm:$0xf] }
  0xb4   : > { %1692 = vmatpush.bf16.msra.mxu0 %v2641_v25  ;;  %v2977_v14 = vor.u32 %v3391_v59, %v2974_v62  ;;  %v2820_v25 = vld [vmem:[%s3866_s6 + $0x3c8] sm:$0xf]  ;;  %v3282_v47 = vld [vmem:[%s3866_s6 + $0x194] sm:$0xf0] }
  0xb5   : > { %1705 = vmatpush.bf16.msra.mxu1 %v2769_v26  ;;  %v3354_v26 = vld [vmem:[%s3866_s6 + $0x3d4] sm:$0xf0]  ;;  %v2532_v45 = vld [vmem:[%s3866_s6 + $0x188] sm:$0xf] }
  0xb6   : > { %1718 = vmatpush.bf16.msra.mxu2 %v2897_v27  ;;  %v2437_v27 = vor.u32 %v3258_v19, %v2436_v18  ;;  %v2821_v33 = vor.u32 %v3354_v26, %v2820_v25  ;;  %v2660_v48 = vld [vmem:[%s3866_s6 + $0x288] sm:$0xf]  ;;  %v3314_v49 = vld [vmem:[%s3866_s6 + $0x294] sm:$0xf0] }
  0xb7   : > { %1731 = vmatpush.bf16.msra.mxu3 %v3025_v31  ;;  %v3254_v31 = vld [vmem:[%s3866_s6 + $0xb4] sm:$0xf0]  ;;  %v2388_v54 = vld [vmem:[%s3866_s6 + $0x68] sm:$0xf] }
  0xb8   : > { %1693 = vmatpush.bf16.msra.mxu0 %v2625_v38  ;;  %v2804_v38 = vld [vmem:[%s3866_s6 + $0x3a8] sm:$0xf]  ;;  %v3346_v51 = vld [vmem:[%s3866_s6 + $0x394] sm:$0xf0] }
  0xb9   : > { %1706 = vmatpush.bf16.msra.mxu1 %v2753_v39  ;;  %v3350_v39 = vld [vmem:[%s3866_s6 + $0x3b4] sm:$0xf0]  ;;  %v2516_v56 = vld [vmem:[%s3866_s6 + $0x168] sm:$0xf] }
  0xba   : > { %1719 = vmatpush.bf16.msra.mxu2 %v2881_v40  ;;  %v2421_v40 = vor.u32 %v3254_v31, %v2420_v30  ;;  %v2805_v46 = vor.u32 %v3350_v39, %v2804_v38  ;;  %v3246_v55 = vld [vmem:[%s3866_s6 + $0x74] sm:$0xf0]  ;;  %v2644_v59 = vld [vmem:[%s3866_s6 + $0x268] sm:$0xf] }
  0xbb   : > { %1732 = vmatpush.bf16.msra.mxu3 %v3009_v44  ;;  %v3250_v44 = vld [vmem:[%s3866_s6 + $0x94] sm:$0xf0]  ;;  %v2772_v63 = vld [vmem:[%s3866_s6 + $0x368] sm:$0xf]  ;;  %v2389_v2 = vor.u32 %v3246_v55, %v2388_v54 }
  0xbc   : > { %1694 = vmatpush.bf16.msra.mxu0 %v2609_v50  ;;  %v2788_v50 = vld [vmem:[%s3866_s6 + $0x388] sm:$0xf]  ;;  %v2405_v35 = vor.u32 %v3250_v44, %v2404_v43  ;;  %v3278_v58 = vld [vmem:[%s3866_s6 + $0x174] sm:$0xf0] }
  0xbd   : > { %1707 = vmatpush.bf16.msra.mxu1 %v2737_v52  ;;  %v2533_v52 = vor.u32 %v3282_v47, %v2532_v45  ;;  %v3310_v62 = vld [vmem:[%s3866_s6 + $0x274] sm:$0xf0]  ;;  %v2372_v7 = vld [vmem:[%s3866_s6 + $0x48] sm:$0xf]  ;;  %v3260_v47 = vld [vmem:[%s3866_s6 + $0xec] sm:$0xf] }
  0xbe   : > { %1720 = vmatpush.bf16.msra.mxu2 %v2865_v53  ;;  %v2661_v53 = vor.u32 %v3314_v49, %v2660_v48  ;;  %v3342_v0 = vld [vmem:[%s3866_s6 + $0x374] sm:$0xf0]  ;;  %v2645_v5 = vor.u32 %v3310_v62, %v2644_v59  ;;  %v2628_v13 = vld [vmem:[%s3866_s6 + $0x248] sm:$0xf]  ;;  %v2454_v48 = vld [vmem:[%s3866_s6 + $0xf8] sm:$0xf0] }
  0xbf   : > { %1733 = vmatpush.bf16.msra.mxu3 %v2993_v57  ;;  %v2789_v57 = vor.u32 %v3346_v51, %v2788_v50  ;;  %v3242_v8 = vld [vmem:[%s3866_s6 + $0x54] sm:$0xf0]  ;;  %v2356_v20 = vld [vmem:[%s3866_s6 + $0x28] sm:$0xf]  ;;  %v3292_v51 = vld [vmem:[%s3866_s6 + $0x1ec] sm:$0xf]  ;;  %v2457_v55 = vor.u32 %v3260_v47, %v2454_v48 }
  0xc0   : > { %1695 = vmatpush.bf16.msra.mxu0 %v2593_v3  ;;  %v2517_v3 = vor.u32 %v3278_v58, %v2516_v56  ;;  %v3274_v12 = vld [vmem:[%s3866_s6 + $0x154] sm:$0xf0]  ;;  %v2484_v22 = vld [vmem:[%s3866_s6 + $0x128] sm:$0xf] }
  0xc1   : > { %1708 = vmatpush.bf16.msra.mxu1 %v2721_v9  ;;  %v2500_v9 = vld [vmem:[%s3866_s6 + $0x148] sm:$0xf]  ;;  %v3270_v24 = vld [vmem:[%s3866_s6 + $0x134] sm:$0xf0] }
  0xc2   : > { %1721 = vmatpush.bf16.msra.mxu2 %v2849_v11  ;;  %v2773_v11 = vor.u32 %v3342_v0, %v2772_v63  ;;  %v2501_v18 = vor.u32 %v3274_v12, %v2500_v9  ;;  %v2612_v25 = vld [vmem:[%s3866_s6 + $0x228] sm:$0xf]  ;;  %v3302_v26 = vld [vmem:[%s3866_s6 + $0x234] sm:$0xf0]  ;;  %v2485_v32 = vor.u32 %v3270_v24, %v2484_v22  ;;  %v3256_v63 = vld [vmem:[%s3866_s6 + $0xcc] sm:$0xf] }
  0xc3   : > { %1734 = vmatpush.bf16.msra.mxu3 %v2977_v14  ;;  %1696 = vmatmul.bf16.vlgmr.msra.gmra.mxu0 %v4026_v60  ;;  %v3306_v14 = vld [vmem:[%s3866_s6 + $0x254] sm:$0xf0]  ;;  %v2340_v30 = vld [vmem:[%s3866_s6 + $0x8] sm:$0xf]  ;;  %v2438_v0 = vld [vmem:[%s3866_s6 + $0xd8] sm:$0xf0] }
  0xc4   : > { %1740 = vmatpush.bf16.msrb.mxu0 %v2453_v15  ;;  %1709 = vmatmul.bf16.vlgmr.msra.gmra.mxu1 %v4033_v1  ;;  %v2756_v15 = vld [vmem:[%s3866_s6 + $0x348] sm:$0xf]  ;;  %v2629_v19 = vor.u32 %v3306_v14, %v2628_v13  ;;  %v3234_v31 = vld [vmem:[%s3866_s6 + $0x14] sm:$0xf0] }
  0xc5   : > { %1753 = vmatpush.bf16.msrb.mxu1 %v2581_v16  ;;  %1722 = vmatmul.bf16.vlgmr.msra.gmra.mxu2 %v4086_v6  ;;  %v3338_v16 = vld [vmem:[%s3866_s6 + $0x354] sm:$0xf0]  ;;  %v2468_v34 = vld [vmem:[%s3866_s6 + $0x108] sm:$0xf]  ;;  %v2341_v45 = vor.u32 %v3234_v31, %v2340_v30  ;;  %v2534_v30 = vld [vmem:[%s3866_s6 + $0x198] sm:$0xf0] }
  0xc6   : > { %1766 = vmatpush.bf16.msrb.mxu2 %v2709_v17  ;;  %1735 = vmatmul.bf16.vlgmr.msra.gmra.mxu3 %v4092_v10  ;;  %v2373_v17 = vor.u32 %v3242_v8, %v2372_v7  ;;  %v2757_v23 = vor.u32 %v3338_v16, %v2756_v15  ;;  %v3266_v36 = vld [vmem:[%s3866_s6 + $0x114] sm:$0xf0]  ;;  %v2596_v37 = vld [vmem:[%s3866_s6 + $0x208] sm:$0xf]  ;;  %v2441_v8 = vor.u32 %v3256_v63, %v2438_v0  ;;  %v3252_v15 = vld [vmem:[%s3866_s6 + $0xac] sm:$0xf] }
  0xc7   : > { %1779 = vmatpush.bf16.msrb.mxu3 %v2837_v21  ;;  %v3238_v21 = vld [vmem:[%s3866_s6 + $0x34] sm:$0xf0]  ;;  %v3092_v44 = vld [vmem:[%s3866_s6 + $0x5e8] sm:$0xf]  ;;  %v2469_v49 = vor.u32 %v3266_v36, %v2468_v34  ;;  %v2422_v16 = vld [vmem:[%s3866_s6 + $0xb8] sm:$0xf0] }
  0xc8   : > { %1741 = vmatpush.bf16.msrb.mxu0 %v2437_v27  ;;  %v2740_v27 = vld [vmem:[%s3866_s6 + $0x328] sm:$0xf]  ;;  %v3298_v39 = vld [vmem:[%s3866_s6 + $0x214] sm:$0xf0] }
  0xc9   : > { %1754 = vmatpush.bf16.msrb.mxu1 %v2565_v28  ;;  %v3334_v28 = vld [vmem:[%s3866_s6 + $0x334] sm:$0xf0]  ;;  %v2597_v50 = vor.u32 %v3298_v39, %v2596_v37  ;;  %v2948_v56 = vld [vmem:[%s3866_s6 + $0x4c8] sm:$0xf] }
  0xca   : > { %1767 = vmatpush.bf16.msrb.mxu2 %v2693_v29  ;;  %v2357_v29 = vor.u32 %v3238_v21, %v2356_v20  ;;  %v2741_v38 = vor.u32 %v3334_v28, %v2740_v27  ;;  %v3390_v43 = vld [vmem:[%s3866_s6 + $0x4f4] sm:$0xf0]  ;;  %v3076_v58 = vld [vmem:[%s3866_s6 + $0x5c8] sm:$0xf]  ;;  %v2425_v21 = vor.u32 %v3252_v15, %v2422_v16  ;;  %v3248_v27 = vld [vmem:[%s3866_s6 + $0x8c] sm:$0xf] }
  0xcb   : > { %1780 = vmatpush.bf16.msrb.mxu3 %v2821_v33  ;;  %v2613_v33 = vor.u32 %v3302_v26, %v2612_v25  ;;  %v3418_v62 = vld [vmem:[%s3866_s6 + $0x5d4] sm:$0xf0]  ;;  %v2932_v9 = vld [vmem:[%s3866_s6 + $0x4a8] sm:$0xf]  ;;  %v2406_v28 = vld [vmem:[%s3866_s6 + $0x98] sm:$0xf0] }
  0xcc   : > { %1742 = vmatpush.bf16.msrb.mxu0 %v2421_v40  ;;  %v2724_v40 = vld [vmem:[%s3866_s6 + $0x308] sm:$0xf]  ;;  %v3077_v7 = vor.u32 %v3418_v62, %v3076_v58  ;;  %v3414_v14 = vld [vmem:[%s3866_s6 + $0x5b4] sm:$0xf0]  ;;  %v3232_v16 = vld [vmem:[%s3866_s6 + $0xc] sm:$0xf] }
  0xcd   : > { %1755 = vmatpush.bf16.msrb.mxu1 %v2549_v41  ;;  %v3330_v41 = vld [vmem:[%s3866_s6 + $0x314] sm:$0xf0]  ;;  %v3060_v12 = vld [vmem:[%s3866_s6 + $0x5a8] sm:$0xf] }
  0xce   : > { %1768 = vmatpush.bf16.msrb.mxu2 %v2677_v42  ;;  %v2964_v42 = vld [vmem:[%s3866_s6 + $0x4e8] sm:$0xf]  ;;  %v3061_v20 = vor.u32 %v3414_v14, %v3060_v12  ;;  %v3410_v26 = vld [vmem:[%s3866_s6 + $0x594] sm:$0xf0] }
  0xcf   : > { %1781 = vmatpush.bf16.msrb.mxu3 %v2805_v46  ;;  %v3422_v46 = vld [vmem:[%s3866_s6 + $0x5f4] sm:$0xf0]  ;;  %v2916_v22 = vld [vmem:[%s3866_s6 + $0x488] sm:$0xf] }
  0xd0   : > { %1743 = vmatpush.bf16.msrb.mxu0 %v2405_v35  ;;  %v2582_v35 = vld [vmem:[%s3866_s6 + $0x1f8] sm:$0xf0]  ;;  %v3093_v54 = vor.u32 %v3422_v46, %v3092_v44  ;;  %v3044_v24 = vld [vmem:[%s3866_s6 + $0x588] sm:$0xf]  ;;  %v3374_v36 = vld [vmem:[%s3866_s6 + $0x474] sm:$0xf0] }
  0xd1   : > { %1756 = vmatpush.bf16.msrb.mxu1 %v2533_v52  ;;  %v2725_v52 = vor.u32 %v3330_v41, %v2724_v40  ;;  %v2585_v59 = vor.u32 %v3292_v51, %v2582_v35  ;;  %v2900_v34 = vld [vmem:[%s3866_s6 + $0x468] sm:$0xf]  ;;  %v3406_v39 = vld [vmem:[%s3866_s6 + $0x574] sm:$0xf0]  ;;  %v3244_v40 = vld [vmem:[%s3866_s6 + $0x6c] sm:$0xf] }
  0xd2   : > { %1769 = vmatpush.bf16.msrb.mxu2 %v2661_v53  ;;  %v2965_v53 = vor.u32 %v3390_v43, %v2964_v42  ;;  %v3028_v37 = vld [vmem:[%s3866_s6 + $0x568] sm:$0xf]  ;;  %v2390_v41 = vld [vmem:[%s3866_s6 + $0x78] sm:$0xf0]  ;;  %v3276_v42 = vld [vmem:[%s3866_s6 + $0x16c] sm:$0xf]  ;;  %v2901_v44 = vor.u32 %v3374_v36, %v2900_v34 }
  0xd3   : > { %1782 = vmatpush.bf16.msrb.mxu3 %v2789_v57  ;;  %v3386_v57 = vld [vmem:[%s3866_s6 + $0x4d4] sm:$0xf0]  ;;  %v2518_v43 = vld [vmem:[%s3866_s6 + $0x178] sm:$0xf0]  ;;  %v2393_v46 = vor.u32 %v3244_v40, %v2390_v41  ;;  %v2884_v47 = vld [vmem:[%s3866_s6 + $0x448] sm:$0xf] }
  0xd4   : > { %1744 = vmatpush.bf16.msrb.mxu0 %v2389_v2  ;;  %v3288_v2 = vld [vmem:[%s3866_s6 + $0x1cc] sm:$0xf]  ;;  %v3370_v48 = vld [vmem:[%s3866_s6 + $0x454] sm:$0xf0]  ;;  %v2868_v58 = vld [vmem:[%s3866_s6 + $0x428] sm:$0xf] }
  0xd5   : > { %1757 = vmatpush.bf16.msrb.mxu1 %v2517_v3  ;;  %v2566_v3 = vld [vmem:[%s3866_s6 + $0x1d8] sm:$0xf0]  ;;  %v3402_v51 = vld [vmem:[%s3866_s6 + $0x554] sm:$0xf0]  ;;  %v3240_v35 = vld [vmem:[%s3866_s6 + $0x4c] sm:$0xf] }
  0xd6   : > { %1770 = vmatpush.bf16.msrb.mxu2 %v2645_v5  ;;  %v2949_v5 = vor.u32 %v3386_v57, %v2948_v56  ;;  %v2569_v13 = vor.u32 %v3288_v2, %v2566_v3  ;;  %v2996_v62 = vld [vmem:[%s3866_s6 + $0x528] sm:$0xf]  ;;  %v3398_v0 = vld [vmem:[%s3866_s6 + $0x534] sm:$0xf0]  ;;  %v3236_v2 = vld [vmem:[%s3866_s6 + $0x2c] sm:$0xf] }
  0xd7   : > { %1783 = vmatpush.bf16.msrb.mxu3 %v2773_v11  ;;  %v3382_v11 = vld [vmem:[%s3866_s6 + $0x4b4] sm:$0xf0]  ;;  %v2358_v3 = vld [vmem:[%s3866_s6 + $0x38] sm:$0xf0]  ;;  %v2997_v12 = vor.u32 %v3398_v0, %v2996_v62  ;;  %v2980_v14 = vld [vmem:[%s3866_s6 + $0x508] sm:$0xf] }
  0xd8   : > { %1745 = vmatpush.bf16.msrb.mxu0 %v2373_v17  ;;  %v3284_v17 = vld [vmem:[%s3866_s6 + $0x1ac] sm:$0xf]  ;;  %v3394_v15 = vld [vmem:[%s3866_s6 + $0x514] sm:$0xf0]  ;;  %v2822_v41 = vld [vmem:[%s3866_s6 + $0x3d8] sm:$0xf0] }
  0xd9   : > { %1758 = vmatpush.bf16.msrb.mxu1 %v2501_v18  ;;  %v2550_v18 = vld [vmem:[%s3866_s6 + $0x1b8] sm:$0xf0]  ;;  %v3312_v62 = vld [vmem:[%s3866_s6 + $0x28c] sm:$0xf] }
  0xda   : > { %1771 = vmatpush.bf16.msrb.mxu2 %v2629_v19  ;;  %v2933_v19 = vor.u32 %v3382_v11, %v2932_v9  ;;  %v2553_v25 = vor.u32 %v3284_v17, %v2550_v18  ;;  %v2852_v9 = vld [vmem:[%s3866_s6 + $0x408] sm:$0xf]  ;;  %v3362_v11 = vld [vmem:[%s3866_s6 + $0x414] sm:$0xf0]  ;;  %v2342_v18 = vld [vmem:[%s3866_s6 + $0x18] sm:$0xf0] }
  0xdb   : > { %1784 = vmatpush.bf16.msrb.mxu3 %v2757_v23  ;;  %v3378_v23 = vld [vmem:[%s3866_s6 + $0x494] sm:$0xf0]  ;;  %v3344_v0 = vld [vmem:[%s3866_s6 + $0x38c] sm:$0xf] }
  0xdc   : > { %1746 = vmatpush.bf16.msrb.mxu0 %v2357_v29  ;;  %v3280_v29 = vld [vmem:[%s3866_s6 + $0x18c] sm:$0xf]  ;;  %v2917_v31 = vor.u32 %v3378_v23, %v2916_v22  ;;  %v2710_v22 = vld [vmem:[%s3866_s6 + $0x2f8] sm:$0xf0] }
  0xdd   : > { %1759 = vmatpush.bf16.msrb.mxu1 %v2485_v32  ;;  %v3045_v32 = vor.u32 %v3410_v26, %v3044_v24  ;;  %v3356_v23 = vld [vmem:[%s3866_s6 + $0x3ec] sm:$0xf]  ;;  %v2853_v24 = vor.u32 %v3362_v11, %v2852_v9 }
  0xde   : > { %1772 = vmatpush.bf16.msrb.mxu2 %v2613_v33  ;;  %v2409_v33 = vor.u32 %v3248_v27, %v2406_v28  ;;  %v3388_v26 = vld [vmem:[%s3866_s6 + $0x4ec] sm:$0xf]  ;;  %v2966_v27 = vld [vmem:[%s3866_s6 + $0x4f8] sm:$0xf0]  ;;  %v2981_v28 = vor.u32 %v3394_v15, %v2980_v14 }
  0xdf   : > { %1785 = vmatpush.bf16.msrb.mxu3 %v2741_v38  ;;  %v2537_v38 = vor.u32 %v3280_v29, %v2534_v30  ;;  %v2345_v29 = vor.u32 %v3232_v16, %v2342_v18  ;;  %v3420_v30 = vld [vmem:[%s3866_s6 + $0x5ec] sm:$0xf]  ;;  %v2969_v36 = vor.u32 %v3388_v26, %v2966_v27  ;;  %v2774_v16 = vld [vmem:[%s3866_s6 + $0x378] sm:$0xf0] }
  0xe0   : > { %1747 = vmatpush.bf16.msrb.mxu0 %v2341_v45  ;;  %v3029_v45 = vor.u32 %v3406_v39, %v3028_v37  ;;  %v3320_v37 = vld [vmem:[%s3866_s6 + $0x2cc] sm:$0xf]  ;;  %v2902_v18 = vld [vmem:[%s3866_s6 + $0x478] sm:$0xf0] }
  0xe1   : > { %1760 = vmatpush.bf16.msrb.mxu1 %v2469_v49  ;;  %v3012_v49 = vld [vmem:[%s3866_s6 + $0x548] sm:$0xf]  ;;  %v3352_v39 = vld [vmem:[%s3866_s6 + $0x3cc] sm:$0xf] }
  0xe2   : > { %1773 = vmatpush.bf16.msrb.mxu2 %v2597_v50  ;;  %v2521_v50 = vor.u32 %v3276_v42, %v2518_v43  ;;  %v3013_v56 = vor.u32 %v3402_v51, %v3012_v49  ;;  %v3384_v42 = vld [vmem:[%s3866_s6 + $0x4cc] sm:$0xf]  ;;  %v2950_v43 = vld [vmem:[%s3866_s6 + $0x4d8] sm:$0xf0] }
  0xe3   : > { %1786 = vmatpush.bf16.msrb.mxu3 %v2725_v52  ;;  %1748 = vmatmul.bf16.vlgmr.msrb.gmra.mxu0 %v4028_v61  ;;  %v2374_v52 = vld [vmem:[%s3866_s6 + $0x58] sm:$0xf0]  ;;  %v3316_v49 = vld [vmem:[%s3866_s6 + $0x2ac] sm:$0xf] }
  0xe4   : > { %1792 = vmatpush.bf16.msra.mxu0 %v2965_v53  ;;  %1761 = vmatmul.bf16.vlgmr.msrb.gmra.mxu1 %v4037_v4  ;;  %v3272_v53 = vld [vmem:[%s3866_s6 + $0x14c] sm:$0xf]  ;;  %v2377_v57 = vor.u32 %v3240_v35, %v2374_v52  ;;  %v2806_v52 = vld [vmem:[%s3866_s6 + $0x3b8] sm:$0xf0] }
  0xe5   : > { %1805 = vmatpush.bf16.msra.mxu1 %v3093_v54  ;;  %1774 = vmatmul.bf16.vlgmr.msrb.gmra.mxu2 %v4026_v60  ;;  %v2502_v54 = vld [vmem:[%s3866_s6 + $0x158] sm:$0xf0]  ;;  %v3348_v51 = vld [vmem:[%s3866_s6 + $0x3ac] sm:$0xf] }
  0xe6   : > { %1818 = vmatpush.bf16.msra.mxu2 %v2457_v55  ;;  %1787 = vmatmul.bf16.vlgmr.msrb.gmra.mxu3 %v4033_v1  ;;  %v2885_v55 = vor.u32 %v3370_v48, %v2884_v47  ;;  %v2505_v63 = vor.u32 %v3272_v53, %v2502_v54  ;;  %v2825_v47 = vor.u32 %v3352_v39, %v2822_v41  ;;  %v3380_v53 = vld [vmem:[%s3866_s6 + $0x4ac] sm:$0xf]  ;;  %v2934_v54 = vld [vmem:[%s3866_s6 + $0x4b8] sm:$0xf0] }
  0xe7   : > { %1831 = vmatpush.bf16.msra.mxu3 %v2585_v59  ;;  %v3366_v59 = vld [vmem:[%s3866_s6 + $0x434] sm:$0xf0]  ;;  %v2953_v48 = vor.u32 %v3384_v42, %v2950_v43  ;;  %v3340_v14 = vld [vmem:[%s3866_s6 + $0x36c] sm:$0xf]  ;;  %v2742_v41 = vld [vmem:[%s3866_s6 + $0x338] sm:$0xf0] }
  0xe8   : > { %1793 = vmatpush.bf16.msra.mxu0 %v2949_v5  ;;  %v3268_v5 = vld [vmem:[%s3866_s6 + $0x12c] sm:$0xf]  ;;  %v2870_v43 = vld [vmem:[%s3866_s6 + $0x438] sm:$0xf0] }
  0xe9   : > { %1806 = vmatpush.bf16.msra.mxu1 %v3077_v7  ;;  %v2486_v7 = vld [vmem:[%s3866_s6 + $0x138] sm:$0xf0]  ;;  %v3336_v26 = vld [vmem:[%s3866_s6 + $0x34c] sm:$0xf] }
  0xea   : > { %1819 = vmatpush.bf16.msra.mxu2 %v2441_v8  ;;  %v2869_v8 = vor.u32 %v3366_v59, %v2868_v58  ;;  %v2489_v17 = vor.u32 %v3268_v5, %v2486_v7  ;;  %v2809_v58 = vor.u32 %v3348_v51, %v2806_v52  ;;  %v2937_v59 = vor.u32 %v3380_v53, %v2934_v54  ;;  %v2918_v5 = vld [vmem:[%s3866_s6 + $0x498] sm:$0xf0]  ;;  %v3408_v7 = vld [vmem:[%s3866_s6 + $0x58c] sm:$0xf] }
  0xeb   : > { %1832 = vmatpush.bf16.msra.mxu3 %v2569_v13  ;;  %v2361_v13 = vor.u32 %v3236_v2, %v2358_v3  ;;  %v2790_v2 = vld [vmem:[%s3866_s6 + $0x398] sm:$0xf0]  ;;  %v3376_v3 = vld [vmem:[%s3866_s6 + $0x48c] sm:$0xf] }
  0xec   : > { %1794 = vmatpush.bf16.msra.mxu0 %v2933_v19  ;;  %v3264_v19 = vld [vmem:[%s3866_s6 + $0x10c] sm:$0xf]  ;;  %v2793_v9 = vor.u32 %v3344_v0, %v2790_v2  ;;  %v2921_v11 = vor.u32 %v3376_v3, %v2918_v5  ;;  %v2726_v52 = vld [vmem:[%s3866_s6 + $0x318] sm:$0xf0]  ;;  %v4338_v2 = vld [vmem:[%s3873_s16] sm:$0xf] }
  0xed   : > { %1807 = vmatpush.bf16.msra.mxu1 %v3061_v20  ;;  %v2470_v20 = vld [vmem:[%s3866_s6 + $0x118] sm:$0xf0]  ;;  %v3332_v39 = vld [vmem:[%s3866_s6 + $0x32c] sm:$0xf] }
  0xee   : > { %1820 = vmatpush.bf16.msra.mxu2 %v2425_v21  ;;  %v3324_v21 = vld [vmem:[%s3866_s6 + $0x2ec] sm:$0xf]  ;;  %v2854_v54 = vld [vmem:[%s3866_s6 + $0x418] sm:$0xf0] }
  0xef   : > { %1833 = vmatpush.bf16.msra.mxu3 %v2553_v25  ;;  %v2838_v25 = vld [vmem:[%s3866_s6 + $0x3f8] sm:$0xf0]  ;;  %v3364_v42 = vld [vmem:[%s3866_s6 + $0x42c] sm:$0xf] }
  0xf0   : > { %1795 = vmatpush.bf16.msra.mxu0 %v2917_v31  ;;  %v3094_v31 = vld [vmem:[%s3866_s6 + $0x5f8] sm:$0xf0]  ;;  %v2841_v34 = vor.u32 %v3356_v23, %v2838_v25  ;;  %v3328_v51 = vld [vmem:[%s3866_s6 + $0x30c] sm:$0xf] }
  0xf1   : > { %1808 = vmatpush.bf16.msra.mxu1 %v3045_v32  ;;  %v2473_v32 = vor.u32 %v3264_v19, %v2470_v20  ;;  %v3097_v40 = vor.u32 %v3420_v30, %v3094_v31  ;;  %v3404_v19 = vld [vmem:[%s3866_s6 + $0x56c] sm:$0xf]  ;;  %v3030_v20 = vld [vmem:[%s3866_s6 + $0x578] sm:$0xf0] }
  0xf2   : > { %1821 = vmatpush.bf16.msra.mxu2 %v2409_v33  ;;  %v2713_v33 = vor.u32 %v3324_v21, %v2710_v22  ;;  %v2777_v22 = vor.u32 %v3340_v14, %v2774_v16  ;;  %v2630_v25 = vld [vmem:[%s3866_s6 + $0x258] sm:$0xf0]  ;;  %v3033_v27 = vor.u32 %v3404_v19, %v3030_v20  ;;  %v3400_v31 = vld [vmem:[%s3866_s6 + $0x54c] sm:$0xf]  ;;  %v3434_v19 = vld [vmem:[%s3879_s14 + $0x58] sm:$0xff] }
  0xf3   : > { %1834 = vmatpush.bf16.msra.mxu3 %v2537_v38  ;;  %v2694_v38 = vld [vmem:[%s3866_s6 + $0x2d8] sm:$0xf0]  ;;  %v3360_v53 = vld [vmem:[%s3866_s6 + $0x40c] sm:$0xf] }
  0xf4   : > { %1796 = vmatpush.bf16.msra.mxu0 %v2901_v44  ;;  %v3416_v44 = vld [vmem:[%s3866_s6 + $0x5cc] sm:$0xf]  ;;  %v2886_v30 = vld [vmem:[%s3866_s6 + $0x458] sm:$0xf0] }
  0xf5   : > { %1809 = vmatpush.bf16.msra.mxu1 %v3029_v45  ;;  %v3078_v45 = vld [vmem:[%s3866_s6 + $0x5d8] sm:$0xf0] }
  0xf6   : > { %1822 = vmatpush.bf16.msra.mxu2 %v2393_v46  ;;  %v2697_v46 = vor.u32 %v3320_v37, %v2694_v38  ;;  %v3081_v35 = vor.u32 %v3416_v44, %v3078_v45  ;;  %v3300_v37 = vld [vmem:[%s3866_s6 + $0x22c] sm:$0xf]  ;;  %v2614_v38 = vld [vmem:[%s3866_s6 + $0x238] sm:$0xf0] }
  0xf7   : > { %1835 = vmatpush.bf16.msra.mxu3 %v2521_v50  ;;  %v2678_v50 = vld [vmem:[%s3866_s6 + $0x2b8] sm:$0xf0]  ;;  %v3396_v44 = vld [vmem:[%s3866_s6 + $0x52c] sm:$0xf] }
  0xf8   : > { %1797 = vmatpush.bf16.msra.mxu0 %v2885_v55  ;;  %v3412_v55 = vld [vmem:[%s3866_s6 + $0x5ac] sm:$0xf]  ;;  %v2998_v45 = vld [vmem:[%s3866_s6 + $0x538] sm:$0xf0] }
  0xf9   : > { %1810 = vmatpush.bf16.msra.mxu1 %v3013_v56  ;;  %v3062_v56 = vld [vmem:[%s3866_s6 + $0x5b8] sm:$0xf0] }
  0xfa   : > { %1823 = vmatpush.bf16.msra.mxu2 %v2377_v57  ;;  %v2681_v57 = vor.u32 %v3316_v49, %v2678_v50  ;;  %v3296_v49 = vld [vmem:[%s3866_s6 + $0x20c] sm:$0xf]  ;;  %v2598_v50 = vld [vmem:[%s3866_s6 + $0x218] sm:$0xf0] }
  0xfb   : > { %1836 = vmatpush.bf16.msra.mxu3 %v2505_v63  ;;  %v2662_v63 = vld [vmem:[%s3866_s6 + $0x298] sm:$0xf0] }
  0xfc   : > { %1798 = vmatpush.bf16.msra.mxu0 %v2869_v8  ;;  %v2665_v8 = vor.u32 %v3312_v62, %v2662_v63  ;;  %v3430_v63 = vld [vmem:[%s3879_s14 + $0x38] sm:$0xff]  ;;  %v3429_v5 = vld [vmem:[%s3879_s14 + $0x30] sm:$0xff] }
  0xfd   : > { %1811 = vmatpush.bf16.msra.mxu1 %v2997_v12  ;;  %v3308_v12 = vld [vmem:[%s3866_s6 + $0x26c] sm:$0xf] }
  0xfe   : > { %1824 = vmatpush.bf16.msra.mxu2 %v2361_v13  ;;  %v2646_v13 = vld [vmem:[%s3866_s6 + $0x278] sm:$0xf0] }
  0xff   : > { %1837 = vmatpush.bf16.msra.mxu3 %v2489_v17  ;;  %v3372_v17 = vld [vmem:[%s3866_s6 + $0x46c] sm:$0xf]  ;;  %v2649_v21 = vor.u32 %v3308_v12, %v2646_v13  ;;  %v3436_v13 = vld [vmem:[%s3879_s14 + $0x68] sm:$0xff] }
 0x100   : > { %1799 = vmatpush.bf16.msra.mxu0 %v2853_v24  ;;  %v2905_v23 = vor.u32 %v3372_v17, %v2902_v18  ;;  %v3304_v24 = vld [vmem:[%s3866_s6 + $0x24c] sm:$0xf] }
 0x101   : > { %1812 = vmatpush.bf16.msra.mxu1 %v2981_v28  ;;  %v2758_v28 = vld [vmem:[%s3866_s6 + $0x358] sm:$0xf0] }
 0x102   : > { %1825 = vmatpush.bf16.msra.mxu2 %v2345_v29  ;;  %v3368_v29 = vld [vmem:[%s3866_s6 + $0x44c] sm:$0xf] }
 0x103   : > { %1838 = vmatpush.bf16.msra.mxu3 %v2473_v32  ;;  %1800 = vmatmul.bf16.vlgmr.msra.gmra.mxu0 %v4086_v6  ;;  %v3014_v32 = vld [vmem:[%s3866_s6 + $0x558] sm:$0xf0] }
 0x104   : > { %1844 = vmatpush.bf16.msrb.mxu0 %v2713_v33  ;;  %1813 = vmatmul.bf16.vlgmr.msra.gmra.mxu1 %v4092_v10  ;;  %v2633_v33 = vor.u32 %v3304_v24, %v2630_v25  ;;  %v3433_v25 = vld [vmem:[%s3879_s14 + $0x50] sm:$0xff] }
 0x105   : > { %1857 = vmatpush.bf16.msrb.mxu1 %v2841_v34  ;;  %1826 = vmatmul.bf16.vlgmr.msra.gmra.mxu2 %v4028_v61  ;;  %v3065_v61 = vor.u32 %v3412_v55, %v3062_v56  ;;  %v2761_v34 = vor.u32 %v3336_v26, %v2758_v28  ;;  %v3392_v55 = vld [vmem:[%s3866_s6 + $0x50c] sm:$0xf]  ;;  %v2982_v56 = vld [vmem:[%s3866_s6 + $0x518] sm:$0xf0]  ;;  %v3446_v26 = vld [vmem:[%s3879_s14 + $0xb8] sm:$0xff] }
 0x106   : > { %1870 = vmatpush.bf16.msrb.mxu2 %v2969_v36  ;;  %1839 = vmatmul.bf16.vlgmr.msra.gmra.mxu3 %v4037_v4  ;;  %v3046_v4 = vld [vmem:[%s3866_s6 + $0x598] sm:$0xf0]  ;;  %v2889_v36 = vor.u32 %v3368_v29, %v2886_v30  ;;  %v2985_v62 = vor.u32 %v3392_v55, %v2982_v56  ;;  %v3432_v29 = vld [vmem:[%s3879_s14 + $0x48] sm:$0xff] }
 0x107   : > { %1883 = vmatpush.bf16.msrb.mxu3 %v3097_v40  ;;  %v3049_v15 = vor.u32 %v3408_v7, %v3046_v4  ;;  %v3017_v40 = vor.u32 %v3400_v31, %v3014_v32  ;;  %v616_v7 = vperm.slane %v4338_v2, 0  ;;  %v3445_v30 = vld [vmem:[%s3879_s14 + $0xb0] sm:$0xff] }
 0x108   : > { %1845 = vmatpush.bf16.msrb.mxu0 %v2697_v46  ;;  %v2617_v46 = vor.u32 %v3300_v37, %v2614_v38  ;;  %v1593_v0 = vpop.f32.mrf.mxu0  ;;  %v3431_v38 = vld [vmem:[%s3879_s14 + $0x40] sm:$0xff]  ;;  %v3441_v55 = vld [vmem:[%s3879_s14 + $0x90] sm:$0xff] }
 0x109   : > { %1858 = vmatpush.bf16.msrb.mxu1 %v2825_v47  ;;  %v2745_v47 = vor.u32 %v3332_v39, %v2742_v41  ;;  %v1594_v12 = vadd.f32 %v1593_v0, %v616_v7  ;;  %v617_v39 = vperm.slane %v4338_v2, 1 }
 0x10a   : > { %1871 = vmatpush.bf16.msrb.mxu2 %v2953_v48  ;;  %v2873_v48 = vor.u32 %v3364_v42, %v2870_v43 }
 0x10b   : > { %1884 = vmatpush.bf16.msrb.mxu3 %v3081_v35  ;;  %v3001_v35 = vor.u32 %v3396_v44, %v2998_v45  ;;  %v3444_v44 = vld [vmem:[%s3879_s14 + $0xa8] sm:$0xff] }
 0x10c   : > { %1846 = vmatpush.bf16.msrb.mxu0 %v2681_v57  ;;  %v2601_v57 = vor.u32 %v3296_v49, %v2598_v50 }
 0x10d   : > { %1859 = vmatpush.bf16.msrb.mxu1 %v2809_v58  ;;  %v2729_v58 = vor.u32 %v3328_v51, %v2726_v52  ;;  %v3442_v51 = vld [vmem:[%s3879_s14 + $0x98] sm:$0xff] }
 0x10e   : > { %1872 = vmatpush.bf16.msrb.mxu2 %v2937_v59  ;;  %v2857_v59 = vor.u32 %v3360_v53, %v2854_v54 }
 0x10f   : > { %1885 = vmatpush.bf16.msrb.mxu3 %v3065_v61  ;;  %v3438_v61 = vld [vmem:[%s3879_s14 + $0x78] sm:$0xff] }
 0x110   : > { %1847 = vmatpush.bf16.msrb.mxu0 %v2665_v8  ;;  %v1606_v3 = vpop.f32.mrf.mxu1  ;;  %v1619_v4 = vpop.f32.mrf.mxu2  ;;  %v3437_v8 = vld [vmem:[%s3879_s14 + $0x70] sm:$0xff] }
 0x111   : > { %1860 = vmatpush.bf16.msrb.mxu1 %v2793_v9  ;;  %v3428_v9 = vld [vmem:[%s3879_s14 + $0x28] sm:$0xff]  ;;  %v1607_v16 = vadd.f32 %v1606_v3, %v1594_v12  ;;  %v3454_v3 = vld [vmem:[%s3879_s14 + $0xf8] sm:$0xff] }
 0x112   : > { %1873 = vmatpush.bf16.msrb.mxu2 %v2921_v11  ;;  %v3452_v12 = vld [vmem:[%s3879_s14 + $0xe8] sm:$0xff] }
 0x113   : > { %1886 = vmatpush.bf16.msrb.mxu3 %v3049_v15  ;;  %v3427_v15 = vld [vmem:[%s3879_s14 + $0x20] sm:$0xff]  ;;  %v1620_v18 = vadd.f32 %v1619_v4, %v1607_v16 }
 0x114   : > { %1848 = vmatpush.bf16.msrb.mxu0 %v2649_v21  ;;  %v3425_v21 = vld [vmem:[%s3879_s14 + $0x10] sm:$0xff] }
 0x115   : > { %1861 = vmatpush.bf16.msrb.mxu1 %v2777_v22  ;;  %v1632_v11 = vpop.f32.mrf.mxu3 }
 0x116   : > { %1874 = vmatpush.bf16.msrb.mxu2 %v2905_v23  ;;  %v1633_v23 = vadd.f32 %v1632_v11, %v1620_v18  ;;  %v618_v11 = vperm.slane %v4338_v2, 2 }
 0x117   : > { %1887 = vmatpush.bf16.msrb.mxu3 %v3033_v27  ;;  %v3424_v27 = vld [vmem:[%s3879_s14 + $0x8] sm:$0xff] }
 0x118   : > { %1849 = vmatpush.bf16.msrb.mxu0 %v2633_v33  ;;  %v1608_v14 = vpop.f32.mrf.mxu1  ;;  %v3423_v33 = vld [vmem:[%s3879_s14] sm:$0xff] }
 0x119   : > { %1862 = vmatpush.bf16.msrb.mxu1 %v2761_v34 }
 0x11a   : > { %1875 = vmatpush.bf16.msrb.mxu2 %v2889_v36 }
 0x11b   : > { %1888 = vmatpush.bf16.msrb.mxu3 %v3017_v40 }
 0x11c   : > { %1850 = vmatpush.bf16.msrb.mxu0 %v2617_v46  ;;  %v3443_v46 = vld [vmem:[%s3879_s14 + $0xa0] sm:$0xff] }
 0x11d   : > { %1863 = vmatpush.bf16.msrb.mxu1 %v2745_v47  ;;  %v1634_v17 = vpop.f32.mrf.mxu3 }
 0x11e   : > { %1876 = vmatpush.bf16.msrb.mxu2 %v2873_v48  ;;  %v3449_v17 = vld [vmem:[%s3879_s14 + $0xd0] sm:$0xff] }
 0x11f   : > { %1889 = vmatpush.bf16.msrb.mxu3 %v3001_v35 }
 0x120   : > { %1851 = vmatpush.bf16.msrb.mxu0 %v2601_v57 }
 0x121   : > { %1864 = vmatpush.bf16.msrb.mxu1 %v2729_v58  ;;  %v1658_v22 = vpop.f32.mrf.mxu1 }
 0x122   : > { %1877 = vmatpush.bf16.msrb.mxu2 %v2857_v59 }
 0x123   : > { %1890 = vmatpush.bf16.msrb.mxu3 %v2985_v62  ;;  %1852 = vmatmul.bf16.vlgmr.msrb.gmra.mxu0 %v4026_v60  ;;  %v1595_v60 = vpop.f32.mrf.mxu0  ;;  %v3440_v62 = vld [vmem:[%s3879_s14 + $0x88] sm:$0xff] }
 0x124   : > { %2157 = vmatpush.bf16.msra.mxu0 %v3430_v63  ;;  %1865 = vmatmul.bf16.vlgmr.msrb.gmra.mxu1 %v4033_v1  ;;  %v1621_v1 = vpop.f32.mrf.mxu2 }
 0x125   : > { %2170 = vmatpush.bf16.msra.mxu1 %v3438_v61  ;;  %1878 = vmatmul.bf16.vlgmr.msrb.gmra.mxu2 %v4086_v6  ;;  %v3435_v6 = vld [vmem:[%s3879_s14 + $0x60] sm:$0xff]  ;;  %v3450_v1 = vld [vmem:[%s3879_s14 + $0xd8] sm:$0xff] }
 0x126   : > { %1891 = vmatmul.bf16.vlgmr.msrb.gmra.mxu3 %v4092_v10  ;;  %v3426_v10 = vld [vmem:[%s3879_s14 + $0x18] sm:$0xff]  ;;  %2183 = vmatpush.bf16.msra.mxu2 %v3446_v26  ;;  %v3439_v61 = vld [vmem:[%s3879_s14 + $0x80] sm:$0xff] }
 0x127   : > { %2196 = vmatpush.bf16.msra.mxu3 %v3454_v3 }
 0x128   : > { %2158 = vmatpush.bf16.msra.mxu0 %v3429_v5 }
 0x129   : > { %2171 = vmatpush.bf16.msra.mxu1 %v3437_v8  ;;  %v1684_v31 = vpop.f32.mrf.mxu3  ;;  %v1660_v34 = vpop.f32.mrf.mxu1  ;;  %v3453_v8 = vld [vmem:[%s3879_s14 + $0xf0] sm:$0xff] }
 0x12a   : > { %2184 = vmatpush.bf16.msra.mxu2 %v3445_v30 }
 0x12b   : > { %v1645_v20 = vpop.f32.mrf.mxu0  ;;  %2197 = vmatpush.bf16.msra.mxu3 %v3453_v8 }
 0x12c   : > { %2159 = vmatpush.bf16.msra.mxu0 %v3428_v9  ;;  %v1671_v24 = vpop.f32.mrf.mxu2  ;;  %v1646_v28 = vadd.f32 %v1645_v20, %v1633_v23 }
 0x12d   : > { %2172 = vmatpush.bf16.msra.mxu1 %v3436_v13  ;;  %v1672_v42 = vadd.f32 %v1671_v24, %v617_v39 }
 0x12e   : > { %v1659_v36 = vadd.f32 %v1658_v22, %v1646_v28  ;;  %2185 = vmatpush.bf16.msra.mxu2 %v3444_v44  ;;  %v3448_v22 = vld [vmem:[%s3879_s14 + $0xc8] sm:$0xff] }
 0x12f   : > { %v1685_v43 = vadd.f32 %v1684_v31, %v1672_v42  ;;  %2198 = vmatpush.bf16.msra.mxu3 %v3452_v12  ;;  %v619_v31 = vperm.slane %v4338_v2, 3 }
 0x130   : > { %2160 = vmatpush.bf16.msra.mxu0 %v3427_v15  ;;  %v1897_v40 = vpack.c.bf16 %v1659_v36, %v1659_v36  ;;  %v3451_v15 = vld [vmem:[%s3879_s14 + $0xe0] sm:$0xff] }
 0x131   : > { %2173 = vmatpush.bf16.msra.mxu1 %v3435_v6  ;;  %v1686_v41 = vpop.f32.mrf.mxu3 }
 0x132   : > { %2186 = vmatpush.bf16.msra.mxu2 %v3443_v46 }
 0x133   : > { %v1647_v32 = vpop.f32.mrf.mxu0  ;;  %2199 = vmatpush.bf16.msra.mxu3 %v3451_v15 }
 0x134   : > { %2161 = vmatpush.bf16.msra.mxu0 %v3426_v10  ;;  %v1673_v37 = vpop.f32.mrf.mxu2 }
 0x135   : > { %2174 = vmatpush.bf16.msra.mxu1 %v3434_v19 }
 0x136   : > { %2187 = vmatpush.bf16.msra.mxu2 %v3442_v51 }
 0x137   : > { %2200 = vmatpush.bf16.msra.mxu3 %v3450_v1 }
 0x138   : > { %2162 = vmatpush.bf16.msra.mxu0 %v3425_v21 }
 0x139   : > { %2175 = vmatpush.bf16.msra.mxu1 %v3433_v25  ;;  %v3447_v25 = vld [vmem:[%s3879_s14 + $0xc0] sm:$0xff] }
 0x13a   : > { %2188 = vmatpush.bf16.msra.mxu2 %v3441_v55 }
 0x13b   : > { %2201 = vmatpush.bf16.msra.mxu3 %v3449_v17 }
 0x13c   : > { %2163 = vmatpush.bf16.msra.mxu0 %v3424_v27 }
 0x13d   : > { %2176 = vmatpush.bf16.msra.mxu1 %v3432_v29 }
 0x13e   : > { %2189 = vmatpush.bf16.msra.mxu2 %v3440_v62 }
 0x13f   : > { %2202 = vmatpush.bf16.msra.mxu3 %v3448_v22 }
 0x140   : > { %2164 = vmatpush.bf16.msra.mxu0 %v3423_v33  ;;  %v1697_v45 = vpop.f32.mrf.mxu0 }
 0x141   : > { %2177 = vmatpush.bf16.msra.mxu1 %v3431_v38  ;;  %v1698_v47 = vadd.f32 %v1697_v45, %v1685_v43  ;;  %v1710_v48 = vpop.f32.mrf.mxu1 }
 0x142   : > { %2190 = vmatpush.bf16.msra.mxu2 %v3439_v61 }
 0x143   : > { %2165 = vmatmul.bf16.vlgmr.msra.gmra.mxu0 %v1897_v40  ;;  %v1711_v49 = vadd.f32 %v1710_v48, %v1698_v47  ;;  %2203 = vmatpush.bf16.msra.mxu3 %v3447_v25 }
 0x148   : > { %v1723_v50 = vpop.f32.mrf.mxu2  ;;  %v1699_v54 = vpop.f32.mrf.mxu0 }
 0x149   : > { %v1724_v35 = vadd.f32 %v1723_v50, %v1711_v49  ;;  %v1736_v52 = vpop.f32.mrf.mxu3  ;;  %v1712_v56 = vpop.f32.mrf.mxu1  ;;  %v1896_v54 = vld [vmem:[#allocation2] sm:$0xff] }
 0x14b   : > { %v1737_v53 = vadd.f32 %v1736_v52, %v1724_v35 }
 0x14d   : > { %v1898_v57 = vpack.c.bf16 %v1737_v53, %v1737_v53 }
 0x14f   : > { %2178 = vmatmul.bf16.vlgmr.msra.gmra.mxu1 %v1898_v57 }
 0x150   : > { %v1725_v58 = vpop.f32.mrf.mxu2 }
 0x151   : > { %v1738_v59 = vpop.f32.mrf.mxu3 }
 0x160   : > { %v1749_v63 = vpop.f32.mrf.mxu0 }
 0x161   : > { %v1762_v0 = vpop.f32.mrf.mxu1  ;;  %v1750_v60 = vadd.f32 %v1749_v63, %v618_v11 }
 0x163   : > { %v1763_v16 = vadd.f32 %v1762_v0, %v1750_v60 }
 0x168   : > { %v1775_v5 = vpop.f32.mrf.mxu2  ;;  %v1751_v7 = vpop.f32.mrf.mxu0 }
 0x169   : > { %v1788_v4 = vpop.f32.mrf.mxu3  ;;  %v1764_v9 = vpop.f32.mrf.mxu1  ;;  %v1776_v6 = vadd.f32 %v1775_v5, %v1763_v16 }
 0x16b   : > { %v1789_v10 = vadd.f32 %v1788_v4, %v1776_v6 }
 0x170   : > { %v1777_v13 = vpop.f32.mrf.mxu2 }
 0x171   : > { %v1790_v14 = vpop.f32.mrf.mxu3 }
 0x180   : > { %v1801_v18 = vpop.f32.mrf.mxu0 }
 0x181   : > { %v1802_v19 = vadd.f32 %v1801_v18, %v1789_v10  ;;  %v1814_v20 = vpop.f32.mrf.mxu1 }
 0x183   : > { %v1815_v21 = vadd.f32 %v1814_v20, %v1802_v19 }
 0x185   : > { %v1899_v23 = vpack.c.bf16 %v1815_v21, %v1815_v21 }
 0x187   : > { %2191 = vmatmul.bf16.vlgmr.msra.gmra.mxu2 %v1899_v23 }
 0x188   : > { %v1827_v24 = vpop.f32.mrf.mxu2  ;;  %v1803_v27 = vpop.f32.mrf.mxu0 }
 0x189   : > { %v1840_v26 = vpop.f32.mrf.mxu3  ;;  %v1816_v28 = vpop.f32.mrf.mxu1  ;;  %v1828_v32 = vadd.f32 %v1827_v24, %v619_v31 }
 0x18b   : > { %v1841_v33 = vadd.f32 %v1840_v26, %v1828_v32 }
 0x190   : > { %v1829_v29 = vpop.f32.mrf.mxu2 }
 0x191   : > { %v1842_v30 = vpop.f32.mrf.mxu3 }
 0x1a0   : > { %v1853_v34 = vpop.f32.mrf.mxu0 }
 0x1a1   : > { %v1866_v36 = vpop.f32.mrf.mxu1  ;;  %v1854_v37 = vadd.f32 %v1853_v34, %v1841_v33 }
 0x1a3   : > { %v1867_v38 = vadd.f32 %v1866_v36, %v1854_v37 }
 0x1a8   : > { %v1879_v39 = vpop.f32.mrf.mxu2  ;;  %v1855_v42 = vpop.f32.mrf.mxu0 }
 0x1a9   : > { %v1880_v40 = vadd.f32 %v1879_v39, %v1867_v38  ;;  %v1892_v41 = vpop.f32.mrf.mxu3  ;;  %v1868_v43 = vpop.f32.mrf.mxu1 }
 0x1ab   : > { %v1893_v44 = vadd.f32 %v1892_v41, %v1880_v40 }
 0x1ad   : > { %v1900_v45 = vpack.c.bf16 %v1893_v44, %v1893_v44 }
 0x1af   : > { %2204 = vmatmul.bf16.vlgmr.msra.gmra.mxu3 %v1900_v45 }
 0x1b0   : > { %v1881_v46 = vpop.f32.mrf.mxu2 }
 0x1b1   : > { %v1894_v47 = vpop.f32.mrf.mxu3 }
 0x1c0   : > { %v2166_v48 = vpop.f32.mrf.mxu0 }
 0x1c8   : > { %v2168_v49 = vpop.f32.mrf.mxu0 }
 0x1cc   : > { %v2179_v50 = vpop.f32.mrf.mxu1 }
 0x1cd   : > { %v2180_v2 = vadd.f32 %v2179_v50, %v2166_v48 }
 0x1d4   : > { %v2181_v51 = vpop.f32.mrf.mxu1 }
 0x20a   : > { %v2192_v35 = vpop.f32.mrf.mxu2 }
 0x20b   : > { %v2193_v53 = vadd.f32 %v2192_v35, %v2180_v2 }
 0x212   : > { %v2194_v52 = vpop.f32.mrf.mxu2 }
 0x232   : > { %v2205_v55 = vpop.f32.mrf.mxu3 }
 0x233   : > { %v2206_v56 = vadd.f32 %v2205_v55, %v2193_v53 }
 0x235   : > { %v2209_v57 = vadd.f32 %v2206_v56, %v1896_v54 }
 0x236   : > { %2214 = sbr.rel (%p3226_p5) target bundleno = 578 (0x242), region = 72 }
 0x237   : > { %2210 = vst [vmem:[#allocation2] sm:$0xff] %v2209_v57 }
 0x23a   : > { %v2207_v58 = vpop.f32.mrf.mxu3 }
 0x23b   : > { %v3525_v62 = vld [vmem:[#allocation8] ss:$0 sm:$0xff] }
 0x23e   : > { %v2215_v59 = vld [vmem:[#allocation2] sm:$0xff] }
 0x23f   : > { %v2220_v63 = vadd.f32 %v3525_v62, %v2215_v59 }
 0x241   : > { %2221 = vst [vmem:[%s4402_s7] sm:$0xff] %v2220_v63 }
 0x242 PF: > { %s4414_s22 = sld [smem:[#allocation13_spill]]  ;;  %p21_p7 = scmp.ge.s32.totalorder %s3758_s28, 4  }
 0x243   : > { %s4415_s26 = sld [smem:[#allocation14_spill]]  ;;  %s4416_s24 = smov %s3680_s25 }
 0x244   : > { %s4418_s27 = smov %s3758_s28  ;;  %23 = sbr.rel (!%p21_p7) target bundleno = 9 (0x9), region = 120 }
 0x248   : > { %s4417_s25 = smov %s4414_s22 }
 0x249   :  { %2233 = vsyncpa [#allocation4], 1 }
 0x24a   :  { %2235 = vsyncpa [#allocation4 + $0x1], 1 }
 0x24b   :  { %2236 = vsyncpa [#allocation6], 1 }
 0x24c   :  { %2238 = vsyncpa [#allocation6 + $0x1], 1 }
 0x24d   :  { %2239 = vsyncpa [#allocation9], 1 }

</bundles_post_ra>
